<compile_context>
chip_gen: v7x
topology: tpu7x:2x2x1
jax: 0.10.0
libtpu: 0.0.40
codegen_flags: <defaults>
</compile_context>

<pallas_src>
import jax
import jax.numpy as jnp
from jax.experimental import pallas as pl
from jax.experimental.pallas import tpu as pltpu


def dueling_q_kernel(x_ref, w1_ref, b1_ref, w2_ref, b2_ref,
                     wva1_ref, bva1_ref, wblk2_ref, bv2_ref, ba2_ref,
                     out_ref):
    bf16 = jnp.bfloat16

    # --- feature layer: Linear -> ReLU -> Linear -> ReLU ---
    # Weights are bf16 in memory; activations stay f32 and are cast to bf16
    # only at the MXU input (f32 accumulate). Keep ReLU on f32 (no bf16 VPU
    # on v5e).
    x = x_ref[...]
    h = jnp.dot(x.astype(bf16), w1_ref[...],
                preferred_element_type=jnp.float32) + b1_ref[...]
    h = jnp.maximum(h, 0.0)
    h = jnp.dot(h.astype(bf16), w2_ref[...],
                preferred_element_type=jnp.float32) + b2_ref[...]
    h = jnp.maximum(h, 0.0)

    # --- fused value|advantage hidden layer: single (I, 2I) matmul ---
    hv = jnp.dot(h.astype(bf16), wva1_ref[...],
                 preferred_element_type=jnp.float32) + bva1_ref[...]
    hv = jnp.maximum(hv, 0.0)

    # --- fused head outputs via a block-diagonal (2I, 1+A) weight ---
    # Column 0 holds wv2 (value head) against hv[:, :I]; columns 1..A hold
    # wa2 (advantage head) against hv[:, I:]; the off-diagonal blocks are
    # zero, so this reproduces both independent heads in one small matmul
    # instead of a degenerate N=1 MXU matmul plus another tiny one.
    q = jnp.dot(hv.astype(bf16), wblk2_ref[...],
                preferred_element_type=jnp.float32)          # (B, 1 + A)
    v = q[:, 0:1] + bv2_ref[...]                              # (B, 1)
    a = q[:, 1:] + ba2_ref[...]                               # (B, A)

    # output = values + (advantages - advantages.mean())
    # NOTE: faithful to the PyTorch module: .mean() with no axis is a GLOBAL
    # mean over all B*A elements (not the per-sample action mean).
    out_ref[...] = (v + (a - jnp.mean(a))).astype(out_ref.dtype)


def init_params(key, state_size, action_size):
    """PyTorch-Linear-style init (U[-1/sqrt(fan_in), 1/sqrt(fan_in)]), f32.

    Weights in (in_features, out_features) layout, biases as (1, out)."""
    internal = state_size * 50

    def linear(k, fan_in, fan_out):
        kw, kb = jax.random.split(k)
        bound = 1.0 / jnp.sqrt(jnp.float32(fan_in))
        w = jax.random.uniform(kw, (fan_in, fan_out), jnp.float32, -bound, bound)
        b = jax.random.uniform(kb, (1, fan_out), jnp.float32, -bound, bound)
        return w, b

    keys = jax.random.split(key, 6)
    w1, b1 = linear(keys[0], state_size, internal)
    w2, b2 = linear(keys[1], internal, internal)
    wv1, bv1 = linear(keys[2], internal, internal)
    wv2, bv2 = linear(keys[3], internal, 1)
    wa1, ba1 = linear(keys[4], internal, internal)
    wa2, ba2 = linear(keys[5], internal, action_size)
    return dict(w1=w1, b1=b1, w2=w2, b2=b2,
                wv1=wv1, bv1=bv1, wv2=wv2, bv2=bv2,
                wa1=wa1, ba1=ba1, wa2=wa2, ba2=ba2)


def prepare_params(p):
    """One-time packing for the kernel: bf16 weights, fused heads.

    Do this ONCE outside the inference loop so weights are not re-packed
    (and their bytes are already halved) on every forward call."""
    internal = p["w2"].shape[0]
    action_size = p["wa2"].shape[1]

    # Fused value|advantage first layer: (I, 2I) weight, (1, 2I) bias.
    wva1 = jnp.concatenate([p["wv1"], p["wa1"]], axis=1)
    bva1 = jnp.concatenate([p["bv1"], p["ba1"]], axis=1)

    # Block-diagonal second layer: (2I, 1 + A).
    wblk2 = jnp.zeros((2 * internal, 1 + action_size), jnp.float32)
    wblk2 = wblk2.at[:internal, 0:1].set(p["wv2"])
    wblk2 = wblk2.at[internal:, 1:].set(p["wa2"])

    bf16 = lambda w: w.astype(jnp.bfloat16)
    return dict(
        w1=bf16(p["w1"]), b1=p["b1"],
        w2=bf16(p["w2"]), b2=p["b2"],
        wva1=bf16(wva1), bva1=bva1,
        wblk2=bf16(wblk2), bv2=p["bv2"], ba2=p["ba2"],
    )


def dueling_q_forward(state, packed):
    """state: (B, state_size) f32. packed: output of prepare_params."""
    B, S = state.shape
    internal = packed["w2"].shape[0]
    action_size = packed["ba2"].shape[1]

    args = (
        state,
        packed["w1"], packed["b1"], packed["w2"], packed["b2"],
        packed["wva1"], packed["bva1"],
        packed["wblk2"], packed["bv2"], packed["ba2"],
    )
    vmem_spec = pl.BlockSpec(memory_space=pltpu.MemorySpace.VMEM)

    flops = 2 * B * (S * internal
                     + internal * internal
                     + internal * 2 * internal
                     + 2 * internal * (1 + action_size))
    bytes_accessed = (sum(int(a.size) * a.dtype.itemsize for a in args)
                      + B * action_size * 4)

    return pl.pallas_call(
        dueling_q_kernel,
        out_shape=jax.ShapeDtypeStruct((B, action_size), jnp.float32),
        in_specs=[vmem_spec] * len(args),
        out_specs=vmem_spec,
        cost_estimate=pl.CostEstimate(flops=flops, transcendentals=0,
                                      bytes_accessed=bytes_accessed),
    )(*args)


def reference_forward(state, p):
    """Pure-JAX reference replicating the kernel's bf16 weight/input rounding."""
    r32 = lambda z: z.astype(jnp.bfloat16).astype(jnp.float32)
    relu = lambda z: jnp.maximum(z, 0.0)
    h = relu(r32(state) @ r32(p["w1"]) + p["b1"])
    h = relu(r32(h) @ r32(p["w2"]) + p["b2"])
    vh = relu(r32(h) @ r32(p["wv1"]) + p["bv1"])
    ah = relu(r32(h) @ r32(p["wa1"]) + p["ba1"])
    v = r32(vh) @ r32(p["wv2"]) + p["bv2"]
    a = r32(ah) @ r32(p["wa2"]) + p["ba2"]
    return v + (a - jnp.mean(a))


if __name__ == "__main__":
    state_size = 8
    action_size = 4
    batch = 2

    key = jax.random.PRNGKey(0)
    k_params, k_state = jax.random.split(key)
    params = init_params(k_params, state_size, action_size)
    packed = prepare_params(params)
    state = jax.random.normal(k_state, (batch, state_size), jnp.float32)

    out = dueling_q_forward(state, packed)
    out = jax.block_until_ready(out)

    ref = reference_forward(state, params)
    assert out.shape == (batch, action_size)
    assert jnp.allclose(out, ref, atol=1e-3, rtol=1e-3), (out, ref)

    print("KERNEL_OK")
</pallas_src>

<mosaic_0001>
module attributes {stable_mosaic.version = 11 : i64} {
  func.func @dueling_q_kernel(%arg0: memref<2x8xf32, #tpu.memory_space<vmem>>, %arg1: memref<8x400xbf16, #tpu.memory_space<vmem>>, %arg2: memref<1x400xf32, #tpu.memory_space<vmem>>, %arg3: memref<400x400xbf16, #tpu.memory_space<vmem>>, %arg4: memref<1x400xf32, #tpu.memory_space<vmem>>, %arg5: memref<400x800xbf16, #tpu.memory_space<vmem>>, %arg6: memref<1x800xf32, #tpu.memory_space<vmem>>, %arg7: memref<800x5xbf16, #tpu.memory_space<vmem>>, %arg8: memref<1x1xf32, #tpu.memory_space<vmem>>, %arg9: memref<1x4xf32, #tpu.memory_space<vmem>>, %arg10: memref<2x4xf32, #tpu.memory_space<vmem>>) attributes {dimension_semantics = [], scalar_prefetch = 0 : i64, scratch_operands = 0 : i64, tpu.core_type = #tpu.core_type<tc>} {
    %c0 = arith.constant 0 : index
    %c0_0 = arith.constant 0 : index
    %0 = vector.load %arg0[%c0, %c0_0] : memref<2x8xf32, #tpu.memory_space<vmem>>, vector<2x8xf32>
    %1 = arith.truncf %0 : vector<2x8xf32> to vector<2x8xbf16>
    %c0_1 = arith.constant 0 : index
    %c0_2 = arith.constant 0 : index
    %2 = vector.load %arg1[%c0_1, %c0_2] : memref<8x400xbf16, #tpu.memory_space<vmem>>, vector<8x400xbf16>
    %cst = arith.constant dense<0.000000e+00> : vector<2x400xf32>
    %3 = tpu.matmul %1, %2, %cst {dimension_numbers = #tpu.dot_dimension_numbers<[1], [0], [0], [1], [0, 0, 1, 1], [], []>} : vector<2x8xbf16>, vector<8x400xbf16>, vector<2x400xf32> -> vector<2x400xf32>
    %c0_3 = arith.constant 0 : index
    %c0_4 = arith.constant 0 : index
    %4 = vector.load %arg2[%c0_3, %c0_4] : memref<1x400xf32, #tpu.memory_space<vmem>>, vector<1x400xf32>
    %5 = vector.broadcast %4 : vector<1x400xf32> to vector<2x400xf32>
    %6 = arith.addf %3, %5 : vector<2x400xf32>
    %cst_5 = arith.constant 0.000000e+00 : f32
    %7 = vector.broadcast %cst_5 : f32 to vector<2x400xf32>
    %8 = arith.maximumf %6, %7 : vector<2x400xf32>
    %9 = arith.truncf %8 : vector<2x400xf32> to vector<2x400xbf16>
    %c0_6 = arith.constant 0 : index
    %c0_7 = arith.constant 0 : index
    %10 = vector.load %arg3[%c0_6, %c0_7] : memref<400x400xbf16, #tpu.memory_space<vmem>>, vector<400x400xbf16>
    %cst_8 = arith.constant dense<0.000000e+00> : vector<2x400xf32>
    %11 = tpu.matmul %9, %10, %cst_8 {dimension_numbers = #tpu.dot_dimension_numbers<[1], [0], [0], [1], [0, 0, 1, 1], [], []>} : vector<2x400xbf16>, vector<400x400xbf16>, vector<2x400xf32> -> vector<2x400xf32>
    %c0_9 = arith.constant 0 : index
    %c0_10 = arith.constant 0 : index
    %12 = vector.load %arg4[%c0_9, %c0_10] : memref<1x400xf32, #tpu.memory_space<vmem>>, vector<1x400xf32>
    %13 = vector.broadcast %12 : vector<1x400xf32> to vector<2x400xf32>
    %14 = arith.addf %11, %13 : vector<2x400xf32>
    %cst_11 = arith.constant 0.000000e+00 : f32
    %15 = vector.broadcast %cst_11 : f32 to vector<2x400xf32>
    %16 = arith.maximumf %14, %15 : vector<2x400xf32>
    %17 = arith.truncf %16 : vector<2x400xf32> to vector<2x400xbf16>
    %c0_12 = arith.constant 0 : index
    %c0_13 = arith.constant 0 : index
    %18 = vector.load %arg5[%c0_12, %c0_13] : memref<400x800xbf16, #tpu.memory_space<vmem>>, vector<400x800xbf16>
    %cst_14 = arith.constant dense<0.000000e+00> : vector<2x800xf32>
    %19 = tpu.matmul %17, %18, %cst_14 {dimension_numbers = #tpu.dot_dimension_numbers<[1], [0], [0], [1], [0, 0, 1, 1], [], []>} : vector<2x400xbf16>, vector<400x800xbf16>, vector<2x800xf32> -> vector<2x800xf32>
    %c0_15 = arith.constant 0 : index
    %c0_16 = arith.constant 0 : index
    %20 = vector.load %arg6[%c0_15, %c0_16] : memref<1x800xf32, #tpu.memory_space<vmem>>, vector<1x800xf32>
    %21 = vector.broadcast %20 : vector<1x800xf32> to vector<2x800xf32>
    %22 = arith.addf %19, %21 : vector<2x800xf32>
    %cst_17 = arith.constant 0.000000e+00 : f32
    %23 = vector.broadcast %cst_17 : f32 to vector<2x800xf32>
    %24 = arith.maximumf %22, %23 : vector<2x800xf32>
    %25 = arith.truncf %24 : vector<2x800xf32> to vector<2x800xbf16>
    %c0_18 = arith.constant 0 : index
    %c0_19 = arith.constant 0 : index
    %26 = vector.load %arg7[%c0_18, %c0_19] : memref<800x5xbf16, #tpu.memory_space<vmem>>, vector<800x5xbf16>
    %cst_20 = arith.constant dense<0.000000e+00> : vector<2x5xf32>
    %27 = tpu.matmul %25, %26, %cst_20 {dimension_numbers = #tpu.dot_dimension_numbers<[1], [0], [0], [1], [0, 0, 1, 1], [], []>} : vector<2x800xbf16>, vector<800x5xbf16>, vector<2x5xf32> -> vector<2x5xf32>
    %28 = vector.extract_strided_slice %27 {offsets = [0, 0], sizes = [2, 1], strides = [1, 1]} : vector<2x5xf32> to vector<2x1xf32>
    %c0_21 = arith.constant 0 : index
    %c0_22 = arith.constant 0 : index
    %29 = vector.load %arg8[%c0_21, %c0_22] : memref<1x1xf32, #tpu.memory_space<vmem>>, vector<1x1xf32>
    %30 = vector.broadcast %29 : vector<1x1xf32> to vector<2x1xf32>
    %31 = arith.addf %28, %30 : vector<2x1xf32>
    %32 = vector.extract_strided_slice %27 {offsets = [0, 1], sizes = [2, 4], strides = [1, 1]} : vector<2x5xf32> to vector<2x4xf32>
    %c0_23 = arith.constant 0 : index
    %c0_24 = arith.constant 0 : index
    %33 = vector.load %arg9[%c0_23, %c0_24] : memref<1x4xf32, #tpu.memory_space<vmem>>, vector<1x4xf32>
    %34 = vector.broadcast %33 : vector<1x4xf32> to vector<2x4xf32>
    %35 = arith.addf %32, %34 : vector<2x4xf32>
    %36 = vector.shape_cast %35 : vector<2x4xf32> to vector<1x2x4xf32>
    %cst_25 = arith.constant dense<0.000000e+00> : vector<1xf32>
    %37 = vector.multi_reduction <add>, %36, %cst_25 [1, 2] : vector<1x2x4xf32> to vector<1xf32>
    %38 = vector.shape_cast %37 : vector<1xf32> to vector<1x1x1xf32>
    %39 = vector.extract %38[0, 0, 0] : f32 from vector<1x1x1xf32>
    %cst_26 = arith.constant 8.000000e+00 : f32
    %40 = arith.divf %39, %cst_26 : f32
    %41 = vector.broadcast %40 : f32 to vector<2x4xf32>
    %42 = arith.subf %35, %41 : vector<2x4xf32>
    %43 = vector.broadcast %31 : vector<2x1xf32> to vector<2x4xf32>
    %44 = arith.addf %43, %42 : vector<2x4xf32>
    %c0_27 = arith.constant 0 : index
    %c0_28 = arith.constant 0 : index
    %45 = vector.load %arg10[%c0_27, %c0_28] : memref<2x4xf32, #tpu.memory_space<vmem>>, vector<2x4xf32>
    tpu.vector_store %arg10[%c0_27, %c0_28], %44 {strides = array<i32>} : memref<2x4xf32, #tpu.memory_space<vmem>>, vector<2x4xf32>,
    return
  }
}

</mosaic_0001>

<bundles_post_ra>
// kernel: tpu_custom_call.1
= control target key start
LH: loop header
LB: loop body
LE: loop exit
PB: predicated region body
PF: predicated region fallthrough
CT: control target
= control target key end

     0   :  { %s4508_s0 = inlined_call_operand.vmem [shape: f32[2,8], index: 0, kind: input, shape index: {}]   ;;  %s4509_s1 = inlined_call_operand.vmem [shape: bf16[8,400], index: 1, kind: input, shape index: {}]   ;;  %s4510_s2 = inlined_call_operand.vmem [shape: f32[1,400], index: 2, kind: input, shape index: {}]   ;;  %s4511_s3 = inlined_call_operand.hbm [shape: bf16[400,400], index: 3, kind: input, shape index: {}]   ;;  %s4512_s4 = inlined_call_operand.vmem [shape: f32[1,400], index: 4, kind: input, shape index: {}]   ;;  %s4513_s5 = inlined_call_operand.hbm [shape: bf16[400,800], index: 5, kind: input, shape index: {}]   ;;  %s4514_s6 = inlined_call_operand.vmem [shape: f32[1,800], index: 6, kind: input, shape index: {}]   ;;  %s4515_s7 = inlined_call_operand.vmem [shape: bf16[800,5], index: 7, kind: input, shape index: {}]   ;;  %s4516_s8 = inlined_call_operand.<no memory space> [shape: f32[1,1], index: 8, kind: input, shape index: {}]   ;;  %s4517_s9 = inlined_call_operand.vmem [shape: f32[1,4], index: 9, kind: input, shape index: {}]   ;;  %s4518_s10 = inlined_call_operand.hbm [shape: f32[2,4], index: 10, kind: output, shape index: {}]  }
   0x1   :  { %v15_v0 = vstv %s4516_s8 }
   0x2   :  { %16 = vst [vmem:[#allocation2] sm:$0x1] %v15_v0 }
   0x3   :  { %17 = vsyncpa [#allocation4], 0 }
   0x4   :  { %18 = vsyncpa [#allocation7], 0 }
   0x5   :  { %19 = vsyncpa [#allocation5], 0  ;;  %s4130_s15 = smov [#allocation3]   ;;  %s4058_s19 = scalar_lea.hbm %s4511_s3, 12800 }
   0x6   :  { %s31_s16 = sshll.u32 %s4130_s15, 4  ;;  %p4059_p0 = scmp.ne.s32.totalorder %s4511_s3, %s4058_s19  ;;  %s32_s16 = int_to_ptr.vmem [resolvable:$true] %s31_s16 }
   0x7   :  { %p4062_p1 = scmp.lt.u32.totalorder %s4058_s19, %s4511_s3 }
   0x9   :  { %p4064_p2 = pnand %p4062_p1, %p4059_p0 }
   0xb   :  { %4067 = shalt.err (!%p4064_p2)
}
   0xc   :  { %s4068_s8 = scalar_lea.vmem %s32_s16, 12800  ;;  %p4073_p4 = scmp.lt.s32.totalorder %s32_s16, %s32_s16 }
   0xd   :  { %p4069_p3 = scmp.ne.s32.totalorder %s32_s16, %s4068_s8  ;;  %p4074_p5 = scmp.lt.s32.totalorder %s4068_s8, %s4068_s8 }
   0xf   :  { %p4075_p6 = por %p4074_p5, %p4073_p4 }
  0x11   :  { %p4076_p7 = pnand %p4075_p6, %p4069_p3 }
  0x13   :  { %4079 = shalt.err (!%p4076_p7)
}
  0x14   :  { %s4131_s24 = smov 256   ;;  %s4132_s25 = smov 16  }
  0x15   :  { %37 = dma.hbm_to_vmem [thread:$0]  %s4511_s3, 12800, %s32_s16, [#allocation4], %s4131_s24, %s4131_s24, %s4132_s25  }
  0x16   :  { %s4133_s28 = smov [#allocation6]   ;;  %s4080_s12 = scalar_lea.hbm %s4513_s5, 22400 }
  0x17   :  { %s45_s29 = sshll.u32 %s4133_s28, 4  ;;  %p4081_p8 = scmp.ne.s32.totalorder %s4513_s5, %s4080_s12  ;;  %s46_s29 = int_to_ptr.vmem [resolvable:$true] %s45_s29 }
  0x18   :  { %p4084_p9 = scmp.lt.u32.totalorder %s4080_s12, %s4513_s5 }
  0x1a   :  { %p4086_p10 = pnand %p4084_p9, %p4081_p8 }
  0x1c   :  { %4089 = shalt.err (!%p4086_p10)
}
  0x1d   :  { %s4090_s18 = scalar_lea.vmem %s46_s29, 22400  ;;  %p4095_p12 = scmp.lt.s32.totalorder %s46_s29, %s46_s29 }
  0x1e   :  { %p4091_p11 = scmp.ne.s32.totalorder %s46_s29, %s4090_s18  ;;  %p4096_p13 = scmp.lt.s32.totalorder %s4090_s18, %s4090_s18 }
  0x20   :  { %p4097_p0 = por %p4096_p13, %p4095_p12 }
  0x22   :  { %p4098_p1 = pnand %p4097_p0, %p4091_p11 }
  0x24   :  { %4101 = shalt.err (!%p4098_p1)
}
  0x25   :  { %s4134_s3 = smov 448   ;;  %s4135_s16 = smov 28  }
  0x26   :  { %51 = dma.hbm_to_vmem [thread:$0]  %s4513_s5, 22400, %s46_s29, [#allocation7], %s4134_s3, %s4134_s3, %s4135_s16  }
  0x27   :  { %4124 = dma.done.wait [#allocation4], 12800  }
  0x28   :  { %4125 = vsyncadd [#allocation4], 4294954496 }
  0x29   :  { %4126 = dma.done.wait [#allocation7], 22400  }
  0x2a   :  { %4127 = vsyncadd [#allocation7], 4294944896  ;;  %v4136_v1 = vmov 0   ;;  %v69_v2 = vld [vmem:[%s4509_s1] sm:$0xff]  ;;  %vm107_vm0 = vcmask 1043456   ;;  %v70_v4 = vld [vmem:[%s4509_s1 + $0x8] sm:$0xff] }
  0x2b   :  { %152 = vmatprep.mubr.bf16.mxu0 %v4136_v1  ;;  %193 = vmatprep.mubr.bf16.mxu1 %v4136_v1  ;;  %v67_v3 = vld [vmem:[%s4508_s0] sm:$0x3]  ;;  %v3118_v5 = vcombine.high %v69_v2, %v69_v2  ;;  %v3117_v6 = vcombine.low %v69_v2, %v69_v2  ;;  %v3120_v7 = vcombine.high %v70_v4, %v70_v4  ;;  %v3610_v9 = vld [vmem:[#allocation3 + $0x4] ss:$16 sps:$4 sm:$0xff]   ;;  %vm103_vm1 = vcmask 64512   ;;  %s4138_s16 = smov 1  }
  0x2c   :  { %3602 = vset.pattern.permute.xlu1 %v4136_v1  ;;  %3603 = vset.pattern.permute.xlu0 %v4136_v1  ;;  %v3119_v8 = vcombine.low %v70_v4, %v70_v4  ;;  %v68_v11 = vpack.c.bf16 %v67_v3, %v67_v3  ;;  %v3613_v12 = vld [vmem:[#allocation3 + $0xc] ss:$16 sps:$4 sm:$0xff]   ;;  %v3608_v14 = vld [vmem:[#allocation3] ss:$16 sps:$4 sm:$0xff]   ;;  %v3611_v15 = vld [vmem:[#allocation3 + $0x8] ss:$16 sps:$4 sm:$0xff]  }
  0x2d   :  { %3121 = vmatprep.subr.msk.bf16.mxu0 %vm107_vm0, %v3118_v5  ;;  %v109_v10 = vsel %vm107_vm0, %v3117_v6, 0  ;;  %3123 = vmatprep.subr.msk.bf16.mxu1 %vm107_vm0, %v3120_v7  ;;  %v3616_v16 = vld [vmem:[#allocation3 + $0x24] ss:$16 sps:$4 sm:$0xff]   ;;  %v3619_v17 = vld [vmem:[#allocation3 + $0x2c] ss:$16 sps:$4 sm:$0xff]   ;;  %vm832_vm2 = vcmask 130048  }
  0x2e   :  { %121 = vmatpush1.bf16.msra.mxu0 %v109_v10  ;;  %v115_v13 = vsel %vm107_vm0, %v3119_v8, 0  ;;  %v3614_v18 = vld [vmem:[#allocation3 + $0x20] ss:$16 sps:$4 sm:$0xff]   ;;  %v3617_v19 = vld [vmem:[#allocation3 + $0x28] ss:$16 sps:$4 sm:$0xff]   ;;  %vm4139_vm3 = vmmov 0  }
  0x2f   :  { %162 = vmatpush1.bf16.msra.mxu1 %v115_v13  ;;  %836 = vmatprep.subr.bf16.mxu0 %v3610_v9  ;;  %v3622_v20 = vld [vmem:[#allocation3 + $0x44] ss:$16 sps:$4 sm:$0xff]   ;;  %v3625_v21 = vld [vmem:[#allocation3 + $0x4c] ss:$16 sps:$4 sm:$0xff]   ;;  %v3620_v22 = vld [vmem:[#allocation3 + $0x40] ss:$16 sps:$4 sm:$0xff]  }
  0x30   :  { %918 = vmatprep.subr.bf16.mxu1 %v3613_v12  ;;  %v3623_v23 = vld [vmem:[#allocation3 + $0x48] ss:$16 sps:$4 sm:$0xff]   ;;  %v3628_v24 = vld [vmem:[#allocation3 + $0x64] ss:$16 sps:$4 sm:$0xff]   ;;  %v3631_v25 = vld [vmem:[#allocation3 + $0x6c] ss:$16 sps:$4 sm:$0xff]  }
  0x31   :  { %3122 = vmatmul.mubr.msk.bf16.vlgmr.msra.gmra.mrb[0].mxu0 %vm103_vm1, %v68_v11  ;;  %v3626_v26 = vld [vmem:[#allocation3 + $0x60] ss:$16 sps:$4 sm:$0xff]   ;;  %v3629_v27 = vld [vmem:[#allocation3 + $0x68] ss:$16 sps:$4 sm:$0xff]   ;;  %v3634_v28 = vld [vmem:[#allocation3 + $0x84] ss:$16 sps:$4 sm:$0xff]  }
  0x32   :  { %3124 = vmatmul.mubr.msk.bf16.vlgmr.msra.gmra.mrb[0].mxu1 %vm103_vm1, %v68_v11  ;;  %837 = vmatpush1.bf16.msra.mxu0 %v3608_v14  ;;  %v3637_v29 = vld [vmem:[#allocation3 + $0x8c] ss:$16 sps:$4 sm:$0xff]   ;;  %v3632_v30 = vld [vmem:[#allocation3 + $0x80] ss:$16 sps:$4 sm:$0xff]   ;;  %v3635_v31 = vld [vmem:[#allocation3 + $0x88] ss:$16 sps:$4 sm:$0xff]  }
  0x33   :  { %919 = vmatpush1.bf16.msra.mxu1 %v3611_v15  ;;  %838 = vmatprep.subr.bf16.mxu0 %v3616_v16  ;;  %v3640_v32 = vld [vmem:[#allocation3 + $0xa4] ss:$16 sps:$4 sm:$0xff]   ;;  %v3643_v33 = vld [vmem:[#allocation3 + $0xac] ss:$16 sps:$4 sm:$0xff]   ;;  %v3638_v34 = vld [vmem:[#allocation3 + $0xa0] ss:$16 sps:$4 sm:$0xff]   ;;  %v73_v15 = vlaneseq }
  0x34   :  { %920 = vmatprep.subr.bf16.mxu1 %v3619_v17  ;;  %v3641_v35 = vld [vmem:[#allocation3 + $0xa8] ss:$16 sps:$4 sm:$0xff]   ;;  %v3646_v36 = vld [vmem:[#allocation3 + $0xc4] ss:$16 sps:$4 sm:$0xff]   ;;  %v3649_v37 = vld [vmem:[#allocation3 + $0xcc] ss:$16 sps:$4 sm:$0xff]  }
  0x35   :  { %v3644_v38 = vld [vmem:[#allocation3 + $0xc0] ss:$16 sps:$4 sm:$0xff]   ;;  %v3647_v39 = vld [vmem:[#allocation3 + $0xc8] ss:$16 sps:$4 sm:$0xff]   ;;  %v3652_v40 = vld [vmem:[#allocation3 + $0xe4] ss:$16 sps:$4 sm:$0xff]  }
  0x36   :  { %839 = vmatpush1.bf16.msra.mxu0 %v3614_v18  ;;  %v3655_v41 = vld [vmem:[#allocation3 + $0xec] ss:$16 sps:$4 sm:$0xff]   ;;  %v3650_v42 = vld [vmem:[#allocation3 + $0xe0] ss:$16 sps:$4 sm:$0xff]   ;;  %v3653_v43 = vld [vmem:[#allocation3 + $0xe8] ss:$16 sps:$4 sm:$0xff]  }
  0x37   :  { %921 = vmatpush1.bf16.msra.mxu1 %v3617_v19  ;;  %840 = vmatprep.subr.bf16.mxu0 %v3622_v20  ;;  %v3658_v44 = vld [vmem:[#allocation3 + $0x104] ss:$16 sps:$4 sm:$0xff]   ;;  %v3661_v45 = vld [vmem:[#allocation3 + $0x10c] ss:$16 sps:$4 sm:$0xff]   ;;  %v3656_v46 = vld [vmem:[#allocation3 + $0x100] ss:$16 sps:$4 sm:$0xff]  }
  0x38   :  { %922 = vmatprep.subr.bf16.mxu1 %v3625_v21  ;;  %v3659_v47 = vld [vmem:[#allocation3 + $0x108] ss:$16 sps:$4 sm:$0xff]   ;;  %v3664_v48 = vld [vmem:[#allocation3 + $0x124] ss:$16 sps:$4 sm:$0xff]   ;;  %v3662_v49 = vld [vmem:[#allocation3 + $0x120] ss:$16 sps:$4 sm:$0xff]  }
  0x39   :  { %v3667_v50 = vld [vmem:[#allocation3 + $0x12c] ss:$16 sps:$4 sm:$0xff]   ;;  %v3665_v51 = vld [vmem:[#allocation3 + $0x128] ss:$16 sps:$4 sm:$0xff]   ;;  %v3670_v52 = vld [vmem:[#allocation3 + $0x144] ss:$16 sps:$4 sm:$0xff]  }
  0x3a   :  { %841 = vmatpush1.bf16.msra.mxu0 %v3620_v22  ;;  %v3673_v53 = vld [vmem:[#allocation3 + $0x14c] ss:$16 sps:$4 sm:$0xff]   ;;  %v3668_v54 = vld [vmem:[#allocation3 + $0x140] ss:$16 sps:$4 sm:$0xff]   ;;  %v3671_v55 = vld [vmem:[#allocation3 + $0x148] ss:$16 sps:$4 sm:$0xff]  }
  0x3b   :  { %923 = vmatpush1.bf16.msra.mxu1 %v3623_v23  ;;  %842 = vmatprep.subr.bf16.mxu0 %v3628_v24  ;;  %v3676_v56 = vld [vmem:[#allocation3 + $0x164] ss:$16 sps:$4 sm:$0xff]   ;;  %v3679_v57 = vld [vmem:[#allocation3 + $0x16c] ss:$16 sps:$4 sm:$0xff]   ;;  %v3674_v58 = vld [vmem:[#allocation3 + $0x160] ss:$16 sps:$4 sm:$0xff]  }
  0x3c   :  { %924 = vmatprep.subr.bf16.mxu1 %v3631_v25  ;;  %v3677_v59 = vld [vmem:[#allocation3 + $0x168] ss:$16 sps:$4 sm:$0xff]   ;;  %v3682_v60 = vld [vmem:[#allocation3 + $0x184] ss:$16 sps:$4 sm:$0xff]   ;;  %v3685_v61 = vld [vmem:[#allocation3 + $0x18c] ss:$16 sps:$4 sm:$0xff]  }
  0x3d   :  { %v3680_v62 = vld [vmem:[#allocation3 + $0x180] ss:$16 sps:$4 sm:$0xff]   ;;  %v3683_v63 = vld [vmem:[#allocation3 + $0x188] ss:$16 sps:$4 sm:$0xff]   ;;  %v3688_v0 = vld [vmem:[#allocation3 + $0x1a4] ss:$16 sps:$4 sm:$0xff]  }
  0x3e   :  { %843 = vmatpush1.bf16.msra.mxu0 %v3626_v26  ;;  %v3691_v2 = vld [vmem:[#allocation3 + $0x1ac] ss:$16 sps:$4 sm:$0xff]   ;;  %v3686_v3 = vld [vmem:[#allocation3 + $0x1a0] ss:$16 sps:$4 sm:$0xff]   ;;  %v3689_v4 = vld [vmem:[#allocation3 + $0x1a8] ss:$16 sps:$4 sm:$0xff]  }
  0x3f   :  { %925 = vmatpush1.bf16.msra.mxu1 %v3629_v27  ;;  %844 = vmatprep.subr.bf16.mxu0 %v3634_v28  ;;  %v3694_v5 = vld [vmem:[#allocation3 + $0x1c4] ss:$16 sps:$4 sm:$0xff]   ;;  %v3697_v6 = vld [vmem:[#allocation3 + $0x1cc] ss:$16 sps:$4 sm:$0xff]   ;;  %v3692_v7 = vld [vmem:[#allocation3 + $0x1c0] ss:$16 sps:$4 sm:$0xff]  }
  0x40   :  { %926 = vmatprep.subr.bf16.mxu1 %v3637_v29  ;;  %v3695_v8 = vld [vmem:[#allocation3 + $0x1c8] ss:$16 sps:$4 sm:$0xff]   ;;  %v3700_v9 = vld [vmem:[#allocation3 + $0x1e4] ss:$16 sps:$4 sm:$0xff]   ;;  %v3703_v10 = vld [vmem:[#allocation3 + $0x1ec] ss:$16 sps:$4 sm:$0xff]  }
  0x41   :  { %v3698_v11 = vld [vmem:[#allocation3 + $0x1e0] ss:$16 sps:$4 sm:$0xff]   ;;  %v3701_v12 = vld [vmem:[#allocation3 + $0x1e8] ss:$16 sps:$4 sm:$0xff]   ;;  %v3706_v13 = vld [vmem:[#allocation3 + $0x204] ss:$16 sps:$4 sm:$0xff]  }
  0x42   :  { %845 = vmatpush1.bf16.msra.mxu0 %v3632_v30  ;;  %v3709_v14 = vld [vmem:[#allocation3 + $0x20c] ss:$16 sps:$4 sm:$0xff]   ;;  %v4237_v16 = vshrl.u32 %v73_v15, 7  ;;  %vm2888_vm4 = vcmask 261120   ;;  %vm3074_vm5 = vcmask 25600   ;;  %s4141_s24 = smov [#allocation8]  }
  0x43   :  { %927 = vmatpush1.bf16.msra.mxu1 %v3635_v31  ;;  %846 = vmatprep.subr.bf16.mxu0 %v3640_v32  ;;  %v4245_v18 = vld [vmem:[%s4510_s2] sm:$0xf]  ;;  %s3107_s0 = sshll.u32 %s4141_s24, 4  ;;  %s3108_s0 = int_to_ptr.vmem [resolvable:$true] %s3107_s0 }
  0x44   :  { %928 = vmatprep.subr.bf16.mxu1 %v3643_v33  ;;  %v4240_v17 = vsub.s32 0, %v4237_v16  ;;  %v4248_v19 = vsub.s32 1, %v4237_v16  ;;  %v4251_v20 = vsub.s32 3, %v4237_v16  ;;  %s4102_s1 = scalar_lea.vmem %s3108_s0, 32  ;;  %p4107_p3 = scmp.lt.s32.totalorder %s3108_s0, %s3108_s0 }
  0x45   :  { %p4103_p2 = scmp.ne.s32.totalorder %s3108_s0, %s4102_s1  ;;  %p4108_p4 = scmp.lt.s32.totalorder %s4102_s1, %s4102_s1 }
  0x46   :  { %847 = vmatpush1.bf16.msra.mxu0 %v3638_v34  ;;  %v76_v21 = vrot.slane %v4245_v18, %v4240_v17  ;;  %v80_v22 = vrot.slane %v4245_v18, %v4248_v19  ;;  %v88_v23 = vrot.slane %v4245_v18, %v4251_v20 }
  0x47   :  { %929 = vmatpush1.bf16.msra.mxu1 %v3641_v35  ;;  %848 = vmatprep.subr.bf16.mxu0 %v3646_v36  ;;  %p4109_p5 = por %p4108_p4, %p4107_p3 }
  0x48   :  { %930 = vmatprep.subr.bf16.mxu1 %v3649_v37 }
  0x49   :  { %p4110_p6 = pnand %p4109_p5, %p4103_p2 }
  0x4a   :  { %849 = vmatpush1.bf16.msra.mxu0 %v3644_v38 }
  0x4b   :  { %931 = vmatpush1.bf16.msra.mxu1 %v3647_v39  ;;  %850 = vmatprep.subr.bf16.mxu0 %v3652_v40  ;;  %v3704_v39 = vld [vmem:[#allocation3 + $0x200] ss:$16 sps:$4 sm:$0xff]   ;;  %v3707_v40 = vld [vmem:[#allocation3 + $0x208] ss:$16 sps:$4 sm:$0xff]  }
  0x4c   :  { %932 = vmatprep.subr.bf16.mxu1 %v3655_v41 }
  0x4e   :  { %851 = vmatpush1.bf16.msra.mxu0 %v3650_v42  ;;  %v3712_v42 = vld [vmem:[#allocation3 + $0x224] ss:$16 sps:$4 sm:$0xff]  }
  0x4f   :  { %933 = vmatpush1.bf16.msra.mxu1 %v3653_v43  ;;  %852 = vmatprep.subr.bf16.mxu0 %v3658_v44  ;;  %v3715_v43 = vld [vmem:[#allocation3 + $0x22c] ss:$16 sps:$4 sm:$0xff]  }
  0x50   :  { %934 = vmatprep.subr.bf16.mxu1 %v3661_v45  ;;  %v3710_v45 = vld [vmem:[#allocation3 + $0x220] ss:$16 sps:$4 sm:$0xff]  }
  0x52   :  { %853 = vmatpush1.bf16.msra.mxu0 %v3656_v46  ;;  %v3713_v46 = vld [vmem:[#allocation3 + $0x228] ss:$16 sps:$4 sm:$0xff]  }
  0x53   :  { %935 = vmatpush1.bf16.msra.mxu1 %v3659_v47  ;;  %854 = vmatprep.subr.bf16.mxu0 %v3664_v48  ;;  %v3718_v47 = vld [vmem:[#allocation3 + $0x244] ss:$16 sps:$4 sm:$0xff]   ;;  %v3721_v48 = vld [vmem:[#allocation3 + $0x24c] ss:$16 sps:$4 sm:$0xff]  }
  0x54   :  { %936 = vmatprep.subr.bf16.mxu1 %v3667_v50  ;;  %v3719_v50 = vld [vmem:[#allocation3 + $0x248] ss:$16 sps:$4 sm:$0xff]  }
  0x56   :  { %855 = vmatpush1.bf16.msra.mxu0 %v3662_v49  ;;  %v3716_v49 = vld [vmem:[#allocation3 + $0x240] ss:$16 sps:$4 sm:$0xff]  }
  0x57   :  { %937 = vmatpush1.bf16.msra.mxu1 %v3665_v51  ;;  %856 = vmatprep.subr.bf16.mxu0 %v3670_v52  ;;  %v3724_v51 = vld [vmem:[#allocation3 + $0x264] ss:$16 sps:$4 sm:$0xff]   ;;  %v3727_v52 = vld [vmem:[#allocation3 + $0x26c] ss:$16 sps:$4 sm:$0xff]  }
  0x58   :  { %938 = vmatprep.subr.bf16.mxu1 %v3673_v53  ;;  %v3722_v53 = vld [vmem:[#allocation3 + $0x260] ss:$16 sps:$4 sm:$0xff]  }
  0x5a   :  { %857 = vmatpush1.bf16.msra.mxu0 %v3668_v54  ;;  %v3725_v54 = vld [vmem:[#allocation3 + $0x268] ss:$16 sps:$4 sm:$0xff]  }
  0x5b   :  { %939 = vmatpush1.bf16.msra.mxu1 %v3671_v55  ;;  %858 = vmatprep.subr.bf16.mxu0 %v3676_v56  ;;  %v3730_v55 = vld [vmem:[#allocation3 + $0x284] ss:$16 sps:$4 sm:$0xff]   ;;  %v3733_v56 = vld [vmem:[#allocation3 + $0x28c] ss:$16 sps:$4 sm:$0xff]  }
  0x5c   :  { %940 = vmatprep.subr.bf16.mxu1 %v3679_v57  ;;  %v3728_v57 = vld [vmem:[#allocation3 + $0x280] ss:$16 sps:$4 sm:$0xff]  }
  0x5e   :  { %859 = vmatpush1.bf16.msra.mxu0 %v3674_v58  ;;  %v3731_v58 = vld [vmem:[#allocation3 + $0x288] ss:$16 sps:$4 sm:$0xff]  }
  0x5f   :  { %941 = vmatpush1.bf16.msra.mxu1 %v3677_v59  ;;  %860 = vmatprep.subr.bf16.mxu0 %v3682_v60  ;;  %v3736_v59 = vld [vmem:[#allocation3 + $0x2a4] ss:$16 sps:$4 sm:$0xff]   ;;  %v3739_v60 = vld [vmem:[#allocation3 + $0x2ac] ss:$16 sps:$4 sm:$0xff]  }
  0x60   :  { %942 = vmatprep.subr.bf16.mxu1 %v3685_v61  ;;  %v3734_v61 = vld [vmem:[#allocation3 + $0x2a0] ss:$16 sps:$4 sm:$0xff]  }
  0x62   :  { %861 = vmatpush1.bf16.msra.mxu0 %v3680_v62  ;;  %v3737_v62 = vld [vmem:[#allocation3 + $0x2a8] ss:$16 sps:$4 sm:$0xff]  }
  0x63   :  { %943 = vmatpush1.bf16.msra.mxu1 %v3683_v63  ;;  %862 = vmatprep.subr.bf16.mxu0 %v3688_v0  ;;  %v4264_v63 = vsub.s32 2, %v4237_v16  ;;  %v3742_v0 = vld [vmem:[#allocation3 + $0x2c4] ss:$16 sps:$4 sm:$0xff]  }
  0x64   :  { %944 = vmatprep.subr.bf16.mxu1 %v3691_v2  ;;  %v3745_v2 = vld [vmem:[#allocation3 + $0x2cc] ss:$16 sps:$4 sm:$0xff]  }
  0x66   :  { %863 = vmatpush1.bf16.msra.mxu0 %v3686_v3  ;;  %v3740_v3 = vld [vmem:[#allocation3 + $0x2c0] ss:$16 sps:$4 sm:$0xff]  }
  0x67   :  { %945 = vmatpush1.bf16.msra.mxu1 %v3689_v4  ;;  %864 = vmatprep.subr.bf16.mxu0 %v3694_v5  ;;  %v3743_v4 = vld [vmem:[#allocation3 + $0x2c8] ss:$16 sps:$4 sm:$0xff]   ;;  %v84_v5 = vrot.slane %v4245_v18, %v4264_v63  ;;  %v3760_v18 = vld [vmem:[#allocation6 + $0x4] ss:$28 sps:$4 sm:$0xff]  }
  0x68   :  { %946 = vmatprep.subr.bf16.mxu1 %v3697_v6  ;;  %v3748_v6 = vld [vmem:[#allocation3 + $0x2e4] ss:$16 sps:$4 sm:$0xff]  }
  0x6a   :  { %865 = vmatpush1.bf16.msra.mxu0 %v3692_v7  ;;  %v3751_v7 = vld [vmem:[#allocation3 + $0x2ec] ss:$16 sps:$4 sm:$0xff]  }
  0x6b   :  { %947 = vmatpush1.bf16.msra.mxu1 %v3695_v8  ;;  %866 = vmatprep.subr.bf16.mxu0 %v3700_v9  ;;  %v3746_v8 = vld [vmem:[#allocation3 + $0x2e0] ss:$16 sps:$4 sm:$0xff]   ;;  %v3749_v9 = vld [vmem:[#allocation3 + $0x2e8] ss:$16 sps:$4 sm:$0xff]  }
  0x6c   :  { %948 = vmatprep.subr.bf16.mxu1 %v3703_v10 }
  0x6e   :  { %867 = vmatpush1.bf16.msra.mxu0 %v3698_v11  ;;  %v3754_v11 = vld [vmem:[#allocation3 + $0x304] ss:$16 sps:$4 sm:$0xff]  }
  0x6f   :  { %949 = vmatpush1.bf16.msra.mxu1 %v3701_v12  ;;  %877 = vmatprep.subr.bf16.mxu0 %v3706_v13  ;;  %v3757_v12 = vld [vmem:[#allocation3 + $0x30c] ss:$16 sps:$4 sm:$0xff]   ;;  %v3752_v13 = vld [vmem:[#allocation3 + $0x300] ss:$16 sps:$4 sm:$0xff]  }
  0x70   :  { %959 = vmatprep.subr.bf16.mxu1 %v3709_v14  ;;  %v3755_v14 = vld [vmem:[#allocation3 + $0x308] ss:$16 sps:$4 sm:$0xff]  }
 0x104   :  { %v154_v24 = vpop.f32.mrb[0].mxu0 }
 0x105   :  { %v155_v25 = vadd.f32 %v154_v24, %v76_v21  ;;  %v156_v26 = vpop.f32.mrb[1].mxu0  ;;  %v4259_v27 = vpop.f32.mrb[0].mxu1  ;;  %v3763_v21 = vld [vmem:[#allocation6 + $0xc] ss:$28 sps:$4 sm:$0xff]  }
 0x106   :  { %v157_v28 = vadd.f32 %v156_v26, %v80_v22  ;;  %v158_v29 = vpop.f32.mrb[2].mxu0  ;;  %v197_v30 = vpop.f32.mrb[1].mxu1  ;;  %v196_v10 = vadd.f32 %v4259_v27, %v84_v5  ;;  %v3758_v22 = vld [vmem:[#allocation6] ss:$28 sps:$4 sm:$0xff]   ;;  %v3764_v27 = vld [vmem:[#allocation6 + $0x38] ss:$28 sps:$4 sm:$0xff]  }
 0x107   :  { %v202_v31 = vmax.f32 %v155_v25, 0.0  ;;  %v159_v32 = vpop.f32.mrb[3].mxu0  ;;  %v198_v33 = vadd.f32 %v197_v30, %v88_v23  ;;  %v199_v34 = vpop.f32.mrb[2].mxu1  ;;  %v3761_v23 = vld [vmem:[#allocation6 + $0x8] ss:$28 sps:$4 sm:$0xff]  }
 0x108   :  { %v203_v35 = vmax.f32 %v157_v28, 0.0  ;;  %v200_v36 = vpop.f32.mrb[3].mxu1  ;;  %v204_v15 = vmax.f32 %v196_v10, 0.0  ;;  %v3766_v25 = vld [vmem:[#allocation6 + $0x3c] ss:$28 sps:$4 sm:$0xff]  }
 0x109   :  { %v205_v37 = vmax.f32 %v198_v33, 0.0  ;;  %v206_v41 = vpack.c.bf16 %v202_v31, %v202_v31  ;;  %v3769_v26 = vld [vmem:[#allocation6 + $0x44] ss:$28 sps:$4 sm:$0xff]   ;;  %v3772_v29 = vld [vmem:[#allocation6 + $0x74] ss:$28 sps:$4 sm:$0xff]  }
 0x10a   :  { %v207_v38 = vpack.c.bf16 %v203_v35, %v203_v35  ;;  %v208_v24 = vpack.c.bf16 %v204_v15, %v204_v15  ;;  %v3767_v28 = vld [vmem:[#allocation6 + $0x40] ss:$28 sps:$4 sm:$0xff]   ;;  %v3770_v31 = vld [vmem:[#allocation6 + $0x70] ss:$28 sps:$4 sm:$0xff]   ;;  %v3773_v32 = vld [vmem:[#allocation6 + $0x78] ss:$28 sps:$4 sm:$0xff]  }
 0x10b   :  { %v209_v44 = vpack.c.bf16 %v205_v37, %v205_v37  ;;  %v3775_v30 = vld [vmem:[#allocation6 + $0x7c] ss:$28 sps:$4 sm:$0xff]   ;;  %v3778_v33 = vld [vmem:[#allocation6 + $0xac] ss:$28 sps:$4 sm:$0xff]   ;;  %v3781_v34 = vld [vmem:[#allocation6 + $0xb4] ss:$28 sps:$4 sm:$0xff]  }
 0x10c   :  { %868 = vmatprep.mubr.bf16.mxu0 %v207_v38  ;;  %950 = vmatprep.mubr.bf16.mxu1 %v207_v38  ;;  %v3776_v35 = vld [vmem:[#allocation6 + $0xa8] ss:$28 sps:$4 sm:$0xff]   ;;  %v3779_v36 = vld [vmem:[#allocation6 + $0xb0] ss:$28 sps:$4 sm:$0xff]  }
 0x10d   :  { %869 = vmatmul.mubr.bf16.vlgmr.msra.gmra.mrb[4].mxu0 %v206_v41  ;;  %951 = vmatmul.mubr.bf16.vlgmr.msra.gmra.mrb[4].mxu1 %v206_v41  ;;  %v3784_v37 = vld [vmem:[#allocation6 + $0xe4] ss:$28 sps:$4 sm:$0xff]   ;;  %v3787_v38 = vld [vmem:[#allocation6 + $0xec] ss:$28 sps:$4 sm:$0xff]   ;;  %v3790_v41 = vld [vmem:[#allocation6 + $0x11c] ss:$28 sps:$4 sm:$0xff]  }
 0x10e   :  { %878 = vmatpush1.bf16.msra.mxu0 %v3704_v39  ;;  %960 = vmatpush1.bf16.msra.mxu1 %v3707_v40  ;;  %v3782_v39 = vld [vmem:[#allocation6 + $0xe0] ss:$28 sps:$4 sm:$0xff]   ;;  %v3785_v40 = vld [vmem:[#allocation6 + $0xe8] ss:$28 sps:$4 sm:$0xff]   ;;  %v3844_v15 = vld [vmem:[#allocation6 + $0x314] ss:$28 sps:$4 sm:$0xff]  }
 0x10f   :  { %879 = vmatprep.subr.bf16.mxu0 %v3712_v42  ;;  %961 = vmatprep.subr.bf16.mxu1 %v3715_v43  ;;  %v3793_v42 = vld [vmem:[#allocation6 + $0x124] ss:$28 sps:$4 sm:$0xff]   ;;  %v3788_v43 = vld [vmem:[#allocation6 + $0x118] ss:$28 sps:$4 sm:$0xff]  }
 0x110   :  { %3225 = vmatprep.mubr.msk.bf16.mxu0 %vm832_vm2, %v209_v44  ;;  %3226 = vmatprep.mubr.msk.bf16.mxu1 %vm832_vm2, %v209_v44  ;;  %v3791_v44 = vld [vmem:[#allocation6 + $0x120] ss:$28 sps:$4 sm:$0xff]   ;;  %v3824_v5 = vld [vmem:[#allocation6 + $0x268] ss:$28 sps:$4 sm:$0xff]  }
 0x111   :  { %v3833_v10 = vld [vmem:[#allocation6 + $0x2a8] ss:$28 sps:$4 sm:$0xff]  }
 0x112   :  { %880 = vmatpush1.bf16.msra.mxu0 %v3710_v45  ;;  %962 = vmatpush1.bf16.msra.mxu1 %v3713_v46  ;;  %v3796_v45 = vld [vmem:[#allocation6 + $0x154] ss:$28 sps:$4 sm:$0xff]   ;;  %v3799_v46 = vld [vmem:[#allocation6 + $0x15c] ss:$28 sps:$4 sm:$0xff]  }
 0x113   :  { %881 = vmatprep.subr.bf16.mxu0 %v3718_v47  ;;  %963 = vmatprep.subr.bf16.mxu1 %v3721_v48  ;;  %v3794_v47 = vld [vmem:[#allocation6 + $0x150] ss:$28 sps:$4 sm:$0xff]   ;;  %v3797_v48 = vld [vmem:[#allocation6 + $0x158] ss:$28 sps:$4 sm:$0xff]  }
 0x116   :  { %882 = vmatpush1.bf16.msra.mxu0 %v3716_v49  ;;  %964 = vmatpush1.bf16.msra.mxu1 %v3719_v50  ;;  %v3802_v49 = vld [vmem:[#allocation6 + $0x18c] ss:$28 sps:$4 sm:$0xff]   ;;  %v3805_v50 = vld [vmem:[#allocation6 + $0x194] ss:$28 sps:$4 sm:$0xff]  }
 0x117   :  { %883 = vmatprep.subr.bf16.mxu0 %v3724_v51  ;;  %965 = vmatprep.subr.bf16.mxu1 %v3727_v52  ;;  %v3800_v51 = vld [vmem:[#allocation6 + $0x188] ss:$28 sps:$4 sm:$0xff]   ;;  %v3803_v52 = vld [vmem:[#allocation6 + $0x190] ss:$28 sps:$4 sm:$0xff]  }
 0x11a   :  { %884 = vmatpush1.bf16.msra.mxu0 %v3722_v53  ;;  %966 = vmatpush1.bf16.msra.mxu1 %v3725_v54  ;;  %v3808_v53 = vld [vmem:[#allocation6 + $0x1c4] ss:$28 sps:$4 sm:$0xff]   ;;  %v3811_v54 = vld [vmem:[#allocation6 + $0x1cc] ss:$28 sps:$4 sm:$0xff]  }
 0x11b   :  { %885 = vmatprep.subr.bf16.mxu0 %v3730_v55  ;;  %967 = vmatprep.subr.bf16.mxu1 %v3733_v56  ;;  %v3806_v55 = vld [vmem:[#allocation6 + $0x1c0] ss:$28 sps:$4 sm:$0xff]   ;;  %v3809_v56 = vld [vmem:[#allocation6 + $0x1c8] ss:$28 sps:$4 sm:$0xff]  }
 0x11e   :  { %886 = vmatpush1.bf16.msra.mxu0 %v3728_v57  ;;  %968 = vmatpush1.bf16.msra.mxu1 %v3731_v58  ;;  %v3814_v57 = vld [vmem:[#allocation6 + $0x1fc] ss:$28 sps:$4 sm:$0xff]   ;;  %v3817_v58 = vld [vmem:[#allocation6 + $0x204] ss:$28 sps:$4 sm:$0xff]  }
 0x11f   :  { %887 = vmatprep.subr.bf16.mxu0 %v3736_v59  ;;  %969 = vmatprep.subr.bf16.mxu1 %v3739_v60  ;;  %v3812_v59 = vld [vmem:[#allocation6 + $0x1f8] ss:$28 sps:$4 sm:$0xff]   ;;  %v3815_v60 = vld [vmem:[#allocation6 + $0x200] ss:$28 sps:$4 sm:$0xff]  }
 0x122   :  { %888 = vmatpush1.bf16.msra.mxu0 %v3734_v61  ;;  %970 = vmatpush1.bf16.msra.mxu1 %v3737_v62  ;;  %v3820_v61 = vld [vmem:[#allocation6 + $0x234] ss:$28 sps:$4 sm:$0xff]   ;;  %v3823_v62 = vld [vmem:[#allocation6 + $0x23c] ss:$28 sps:$4 sm:$0xff]  }
 0x123   :  { %889 = vmatprep.subr.bf16.mxu0 %v3742_v0  ;;  %971 = vmatprep.subr.bf16.mxu1 %v3745_v2  ;;  %v3818_v0 = vld [vmem:[#allocation6 + $0x230] ss:$28 sps:$4 sm:$0xff]   ;;  %v3821_v2 = vld [vmem:[#allocation6 + $0x238] ss:$28 sps:$4 sm:$0xff]  }
 0x126   :  { %890 = vmatpush1.bf16.msra.mxu0 %v3740_v3  ;;  %972 = vmatpush1.bf16.msra.mxu1 %v3743_v4  ;;  %v3826_v3 = vld [vmem:[#allocation6 + $0x26c] ss:$28 sps:$4 sm:$0xff]   ;;  %v3829_v4 = vld [vmem:[#allocation6 + $0x274] ss:$28 sps:$4 sm:$0xff]  }
 0x127   :  { %891 = vmatprep.subr.bf16.mxu0 %v3748_v6  ;;  %973 = vmatprep.subr.bf16.mxu1 %v3751_v7  ;;  %v3827_v6 = vld [vmem:[#allocation6 + $0x270] ss:$28 sps:$4 sm:$0xff]   ;;  %v3832_v7 = vld [vmem:[#allocation6 + $0x2a4] ss:$28 sps:$4 sm:$0xff]  }
 0x12a   :  { %892 = vmatpush1.bf16.msra.mxu0 %v3746_v8  ;;  %974 = vmatpush1.bf16.msra.mxu1 %v3749_v9  ;;  %v3835_v8 = vld [vmem:[#allocation6 + $0x2ac] ss:$28 sps:$4 sm:$0xff]   ;;  %v3830_v9 = vld [vmem:[#allocation6 + $0x2a0] ss:$28 sps:$4 sm:$0xff]  }
 0x12b   :  { %893 = vmatprep.subr.bf16.mxu0 %v3754_v11  ;;  %975 = vmatprep.subr.bf16.mxu1 %v3757_v12  ;;  %v3838_v11 = vld [vmem:[#allocation6 + $0x2dc] ss:$28 sps:$4 sm:$0xff]   ;;  %v3841_v12 = vld [vmem:[#allocation6 + $0x2e4] ss:$28 sps:$4 sm:$0xff]  }
 0x12e   :  { %894 = vmatpush1.bf16.msra.mxu0 %v3752_v13  ;;  %976 = vmatpush1.bf16.msra.mxu1 %v3755_v14  ;;  %v3836_v13 = vld [vmem:[#allocation6 + $0x2d8] ss:$28 sps:$4 sm:$0xff]   ;;  %v3839_v14 = vld [vmem:[#allocation6 + $0x2e0] ss:$28 sps:$4 sm:$0xff]  }
 0x12f   :  { %2148 = vmatprep.subr.bf16.mxu0 %v3760_v18  ;;  %2230 = vmatprep.subr.bf16.mxu1 %v3763_v21  ;;  %v3847_v18 = vld [vmem:[#allocation6 + $0x31c] ss:$28 sps:$4 sm:$0xff]   ;;  %v3842_v21 = vld [vmem:[#allocation6 + $0x310] ss:$28 sps:$4 sm:$0xff]  }
 0x131   :  { %910 = vmatmul.mubr.bf16.vlgmr.msra.gmra.mrb[4].mxu0 %v208_v24  ;;  %992 = vmatmul.mubr.bf16.vlgmr.msra.gmra.mrb[4].mxu1 %v208_v24  ;;  %v3853_v24 = vld [vmem:[#allocation6 + $0x354] ss:$28 sps:$4 sm:$0xff]  }
 0x132   :  { %2149 = vmatpush1.bf16.msra.mxu0 %v3758_v22  ;;  %2231 = vmatpush1.bf16.msra.mxu1 %v3761_v23  ;;  %v3845_v22 = vld [vmem:[#allocation6 + $0x318] ss:$28 sps:$4 sm:$0xff]   ;;  %v3850_v23 = vld [vmem:[#allocation6 + $0x34c] ss:$28 sps:$4 sm:$0xff]  }
 0x133   :  { %2150 = vmatprep.subr.bf16.mxu0 %v3766_v25  ;;  %2232 = vmatprep.subr.bf16.mxu1 %v3769_v26  ;;  %v3848_v25 = vld [vmem:[#allocation6 + $0x348] ss:$28 sps:$4 sm:$0xff]   ;;  %v3851_v26 = vld [vmem:[#allocation6 + $0x350] ss:$28 sps:$4 sm:$0xff]  }
 0x136   :  { %2151 = vmatpush1.bf16.msra.mxu0 %v3764_v27  ;;  %2233 = vmatpush1.bf16.msra.mxu1 %v3767_v28  ;;  %v3856_v27 = vld [vmem:[#allocation6 + $0x384] ss:$28 sps:$4 sm:$0xff]   ;;  %v3859_v28 = vld [vmem:[#allocation6 + $0x38c] ss:$28 sps:$4 sm:$0xff]  }
 0x137   :  { %2152 = vmatprep.subr.bf16.mxu0 %v3772_v29  ;;  %2234 = vmatprep.subr.bf16.mxu1 %v3775_v30  ;;  %v4272_v29 = vld [vmem:[%s4512_s4] sm:$0xf] }
 0x138   :  { %v315_v30 = vrot.slane %v4272_v29, %v4240_v17 }
 0x13a   :  { %2153 = vmatpush1.bf16.msra.mxu0 %v3770_v31  ;;  %2235 = vmatpush1.bf16.msra.mxu1 %v3773_v32  ;;  %v319_v31 = vrot.slane %v4272_v29, %v4248_v19  ;;  %v327_v32 = vrot.slane %v4272_v29, %v4251_v20 }
 0x13b   :  { %2154 = vmatprep.subr.bf16.mxu0 %v3778_v33  ;;  %2236 = vmatprep.subr.bf16.mxu1 %v3781_v34 }
 0x13e   :  { %2155 = vmatpush1.bf16.msra.mxu0 %v3776_v35  ;;  %2237 = vmatpush1.bf16.msra.mxu1 %v3779_v36 }
 0x13f   :  { %2156 = vmatprep.subr.bf16.mxu0 %v3784_v37  ;;  %2238 = vmatprep.subr.bf16.mxu1 %v3787_v38 }
 0x142   :  { %2157 = vmatpush1.bf16.msra.mxu0 %v3782_v39  ;;  %2239 = vmatpush1.bf16.msra.mxu1 %v3785_v40 }
 0x143   :  { %2158 = vmatprep.subr.bf16.mxu0 %v3790_v41  ;;  %2240 = vmatprep.subr.bf16.mxu1 %v3793_v42 }
 0x146   :  { %2159 = vmatpush1.bf16.msra.mxu0 %v3788_v43  ;;  %2241 = vmatpush1.bf16.msra.mxu1 %v3791_v44 }
 0x147   :  { %2160 = vmatprep.subr.bf16.mxu0 %v3796_v45  ;;  %2242 = vmatprep.subr.bf16.mxu1 %v3799_v46 }
 0x14a   :  { %2161 = vmatpush1.bf16.msra.mxu0 %v3794_v47  ;;  %2243 = vmatpush1.bf16.msra.mxu1 %v3797_v48  ;;  %v3854_v48 = vld [vmem:[#allocation6 + $0x380] ss:$28 sps:$4 sm:$0xff]  }
 0x14b   :  { %2162 = vmatprep.subr.bf16.mxu0 %v3802_v49  ;;  %2244 = vmatprep.subr.bf16.mxu1 %v3805_v50  ;;  %v3857_v49 = vld [vmem:[#allocation6 + $0x388] ss:$28 sps:$4 sm:$0xff]  }
 0x14e   :  { %2163 = vmatpush1.bf16.msra.mxu0 %v3800_v51  ;;  %2245 = vmatpush1.bf16.msra.mxu1 %v3803_v52  ;;  %v3862_v51 = vld [vmem:[#allocation6 + $0x3bc] ss:$28 sps:$4 sm:$0xff]   ;;  %v3865_v52 = vld [vmem:[#allocation6 + $0x3c4] ss:$28 sps:$4 sm:$0xff]  }
 0x14f   :  { %2164 = vmatprep.subr.bf16.mxu0 %v3808_v53  ;;  %2246 = vmatprep.subr.bf16.mxu1 %v3811_v54  ;;  %v3860_v54 = vld [vmem:[#allocation6 + $0x3b8] ss:$28 sps:$4 sm:$0xff]  }
 0x152   :  { %2165 = vmatpush1.bf16.msra.mxu0 %v3806_v55  ;;  %2247 = vmatpush1.bf16.msra.mxu1 %v3809_v56  ;;  %v3863_v55 = vld [vmem:[#allocation6 + $0x3c0] ss:$28 sps:$4 sm:$0xff]   ;;  %v3868_v56 = vld [vmem:[#allocation6 + $0x3f4] ss:$28 sps:$4 sm:$0xff]  }
 0x153   :  { %2166 = vmatprep.subr.bf16.mxu0 %v3814_v57  ;;  %2248 = vmatprep.subr.bf16.mxu1 %v3817_v58  ;;  %v3871_v57 = vld [vmem:[#allocation6 + $0x3fc] ss:$28 sps:$4 sm:$0xff]   ;;  %v3866_v58 = vld [vmem:[#allocation6 + $0x3f0] ss:$28 sps:$4 sm:$0xff]  }
 0x156   :  { %2167 = vmatpush1.bf16.msra.mxu0 %v3812_v59  ;;  %2249 = vmatpush1.bf16.msra.mxu1 %v3815_v60  ;;  %v3869_v59 = vld [vmem:[#allocation6 + $0x3f8] ss:$28 sps:$4 sm:$0xff]   ;;  %v3874_v60 = vld [vmem:[#allocation6 + $0x42c] ss:$28 sps:$4 sm:$0xff]  }
 0x157   :  { %2168 = vmatprep.subr.bf16.mxu0 %v3820_v61  ;;  %2250 = vmatprep.subr.bf16.mxu1 %v3823_v62  ;;  %v3877_v61 = vld [vmem:[#allocation6 + $0x434] ss:$28 sps:$4 sm:$0xff]   ;;  %v3872_v62 = vld [vmem:[#allocation6 + $0x428] ss:$28 sps:$4 sm:$0xff]  }
 0x15a   :  { %2169 = vmatpush1.bf16.msra.mxu0 %v3818_v0  ;;  %2251 = vmatpush1.bf16.msra.mxu1 %v3821_v2  ;;  %v3875_v0 = vld [vmem:[#allocation6 + $0x430] ss:$28 sps:$4 sm:$0xff]   ;;  %v3880_v2 = vld [vmem:[#allocation6 + $0x464] ss:$28 sps:$4 sm:$0xff]  }
 0x15b   :  { %2170 = vmatprep.subr.bf16.mxu0 %v3826_v3  ;;  %2252 = vmatprep.subr.bf16.mxu1 %v3829_v4  ;;  %v3883_v3 = vld [vmem:[#allocation6 + $0x46c] ss:$28 sps:$4 sm:$0xff]   ;;  %v3878_v4 = vld [vmem:[#allocation6 + $0x460] ss:$28 sps:$4 sm:$0xff]  }
 0x15e   :  { %2171 = vmatpush1.bf16.msra.mxu0 %v3824_v5  ;;  %2253 = vmatpush1.bf16.msra.mxu1 %v3827_v6  ;;  %v3881_v5 = vld [vmem:[#allocation6 + $0x468] ss:$28 sps:$4 sm:$0xff]   ;;  %v3886_v6 = vld [vmem:[#allocation6 + $0x49c] ss:$28 sps:$4 sm:$0xff]  }
 0x15f   :  { %2172 = vmatprep.subr.bf16.mxu0 %v3832_v7  ;;  %2254 = vmatprep.subr.bf16.mxu1 %v3835_v8  ;;  %v3889_v7 = vld [vmem:[#allocation6 + $0x4a4] ss:$28 sps:$4 sm:$0xff]   ;;  %v3884_v8 = vld [vmem:[#allocation6 + $0x498] ss:$28 sps:$4 sm:$0xff]  }
 0x162   :  { %2173 = vmatpush1.bf16.msra.mxu0 %v3830_v9  ;;  %2255 = vmatpush1.bf16.msra.mxu1 %v3833_v10  ;;  %v3887_v9 = vld [vmem:[#allocation6 + $0x4a0] ss:$28 sps:$4 sm:$0xff]   ;;  %v3892_v10 = vld [vmem:[#allocation6 + $0x4d4] ss:$28 sps:$4 sm:$0xff]  }
 0x163   :  { %2174 = vmatprep.subr.bf16.mxu0 %v3838_v11  ;;  %2256 = vmatprep.subr.bf16.mxu1 %v3841_v12  ;;  %v3895_v11 = vld [vmem:[#allocation6 + $0x4dc] ss:$28 sps:$4 sm:$0xff]   ;;  %v3890_v12 = vld [vmem:[#allocation6 + $0x4d0] ss:$28 sps:$4 sm:$0xff]  }
 0x166   :  { %2175 = vmatpush1.bf16.msra.mxu0 %v3836_v13  ;;  %2257 = vmatpush1.bf16.msra.mxu1 %v3839_v14  ;;  %v3893_v13 = vld [vmem:[#allocation6 + $0x4d8] ss:$28 sps:$4 sm:$0xff]   ;;  %v323_v14 = vrot.slane %v4272_v29, %v4264_v63 }
 0x167   :  { %2176 = vmatprep.subr.bf16.mxu0 %v3844_v15  ;;  %2258 = vmatprep.subr.bf16.mxu1 %v3847_v18  ;;  %v3898_v15 = vld [vmem:[#allocation6 + $0x50c] ss:$28 sps:$4 sm:$0xff]   ;;  %v3901_v18 = vld [vmem:[#allocation6 + $0x514] ss:$28 sps:$4 sm:$0xff]  }
 0x168   :  { %v3910_v29 = vld [vmem:[#allocation6 + $0x14] ss:$28 sps:$4 sm:$0xff]  }
 0x16a   :  { %2177 = vmatpush1.bf16.msra.mxu0 %v3842_v21  ;;  %2259 = vmatpush1.bf16.msra.mxu1 %v3845_v22  ;;  %v3896_v21 = vld [vmem:[#allocation6 + $0x508] ss:$28 sps:$4 sm:$0xff]   ;;  %v3899_v22 = vld [vmem:[#allocation6 + $0x510] ss:$28 sps:$4 sm:$0xff]  }
 0x16b   :  { %2178 = vmatprep.subr.bf16.mxu0 %v3850_v23  ;;  %2260 = vmatprep.subr.bf16.mxu1 %v3853_v24  ;;  %v3904_v24 = vld [vmem:[#allocation6 + $0x544] ss:$28 sps:$4 sm:$0xff]  }
 0x16e   :  { %2179 = vmatpush1.bf16.msra.mxu0 %v3848_v25  ;;  %2261 = vmatpush1.bf16.msra.mxu1 %v3851_v26  ;;  %v3907_v25 = vld [vmem:[#allocation6 + $0x54c] ss:$28 sps:$4 sm:$0xff]   ;;  %v3902_v26 = vld [vmem:[#allocation6 + $0x540] ss:$28 sps:$4 sm:$0xff]  }
 0x16f   :  { %2189 = vmatprep.subr.bf16.mxu0 %v3856_v27  ;;  %2271 = vmatprep.subr.bf16.mxu1 %v3859_v28  ;;  %v3905_v27 = vld [vmem:[#allocation6 + $0x548] ss:$28 sps:$4 sm:$0xff]  }
 0x204   :  { %v911_v33 = vpop.f32.mrb[4].mxu0  ;;  %v4280_v34 = vpop.f32.mrb[4].mxu1 }
 0x205   :  { %v3558_v35 = vadd.f32 %v911_v33, %v315_v30  ;;  %v913_v36 = vpop.f32.mrb[5].mxu0  ;;  %v995_v37 = vpop.f32.mrb[5].mxu1  ;;  %v3560_v23 = vadd.f32 %v4280_v34, %v323_v14  ;;  %v3911_v30 = vld [vmem:[#allocation6 + $0x1d8] ss:$28 sps:$4 sm:$0xff]   ;;  %v3915_v34 = vld [vmem:[#allocation6 + $0x4c] ss:$28 sps:$4 sm:$0xff]  }
 0x206   :  { %v3559_v38 = vadd.f32 %v913_v36, %v319_v31  ;;  %v3561_v39 = vadd.f32 %v995_v37, %v327_v32  ;;  %v915_v40 = vpop.f32.mrb[6].mxu0  ;;  %v997_v41 = vpop.f32.mrb[6].mxu1  ;;  %v3908_v31 = vld [vmem:[#allocation6 + $0x10] ss:$28 sps:$4 sm:$0xff]   ;;  %v3912_v33 = vld [vmem:[#allocation6 + $0x18] ss:$28 sps:$4 sm:$0xff]  }
 0x207   :  { %v1000_v42 = vmax.f32 %v3558_v35, 0.0  ;;  %v916_v43 = vpop.f32.mrb[7].mxu0  ;;  %v998_v44 = vpop.f32.mrb[7].mxu1  ;;  %v1002_v28 = vmax.f32 %v3560_v23, 0.0  ;;  %v3916_v35 = vld [vmem:[#allocation6 + $0x210] ss:$28 sps:$4 sm:$0xff]  }
 0x208   :  { %v1001_v45 = vmax.f32 %v3559_v38, 0.0  ;;  %v1003_v46 = vmax.f32 %v3561_v39, 0.0  ;;  %v3913_v36 = vld [vmem:[#allocation6 + $0x48] ss:$28 sps:$4 sm:$0xff]   ;;  %v3917_v37 = vld [vmem:[#allocation6 + $0x50] ss:$28 sps:$4 sm:$0xff]  }
 0x209   :  { %v4284_v50 = vpack.c.bf16 %v1000_v42, %v1000_v42  ;;  %v4299_v32 = vpack.c.bf16 %v1002_v28, %v1002_v28  ;;  %v3920_v38 = vld [vmem:[#allocation6 + $0x84] ss:$28 sps:$4 sm:$0xff]   ;;  %v3925_v42 = vld [vmem:[#allocation6 + $0xbc] ss:$28 sps:$4 sm:$0xff]   ;;  %v3966_v14 = vld [vmem:[#allocation6 + $0x2b4] ss:$28 sps:$4 sm:$0xff]  }
 0x20a   :  { %v4282_v47 = vpack.c.bf16 %v1001_v45, %v1001_v45  ;;  %v4288_v53 = vpack.c.bf16 %v1003_v46, %v1003_v46  ;;  %v3921_v39 = vld [vmem:[#allocation6 + $0x248] ss:$28 sps:$4 sm:$0xff]   ;;  %v3918_v40 = vld [vmem:[#allocation6 + $0x80] ss:$28 sps:$4 sm:$0xff]   ;;  %v3923_v44 = vld [vmem:[#allocation6 + $0xb8] ss:$28 sps:$4 sm:$0xff]  }
 0x20b   :  { %v3922_v41 = vld [vmem:[#allocation6 + $0x88] ss:$28 sps:$4 sm:$0xff]   ;;  %v3926_v43 = vld [vmem:[#allocation6 + $0x280] ss:$28 sps:$4 sm:$0xff]   ;;  %v3930_v46 = vld [vmem:[#allocation6 + $0xf4] ss:$28 sps:$4 sm:$0xff]  }
 0x20c   :  { %2180 = vmatprep.mubr.bf16.mxu0 %v4282_v47  ;;  %2262 = vmatprep.mubr.bf16.mxu1 %v4282_v47  ;;  %v3927_v45 = vld [vmem:[#allocation6 + $0xc0] ss:$28 sps:$4 sm:$0xff]   ;;  %v3971_v23 = vld [vmem:[#allocation6 + $0x4b0] ss:$28 sps:$4 sm:$0xff]   ;;  %v3976_v28 = vld [vmem:[#allocation6 + $0x358] ss:$28 sps:$4 sm:$0xff]  }
 0x20d   :  { %2181 = vmatmul.mubr.bf16.vlgmr.msra.gmra.mrb[8].mxu0 %v4284_v50  ;;  %2263 = vmatmul.mubr.bf16.vlgmr.msra.gmra.mrb[8].mxu1 %v4284_v50 }
 0x20e   :  { %2190 = vmatpush1.bf16.msra.mxu0 %v3854_v48  ;;  %2272 = vmatpush1.bf16.msra.mxu1 %v3857_v49  ;;  %v3928_v48 = vld [vmem:[#allocation6 + $0xf0] ss:$28 sps:$4 sm:$0xff]   ;;  %v3932_v49 = vld [vmem:[#allocation6 + $0xf8] ss:$28 sps:$4 sm:$0xff]  }
 0x20f   :  { %3402 = vmatprep.mubr.msk.bf16.mxu0 %vm832_vm2, %v4288_v53  ;;  %3403 = vmatprep.mubr.msk.bf16.mxu1 %vm832_vm2, %v4288_v53 }
 0x210   :  { %2191 = vmatprep.subr.bf16.mxu0 %v3862_v51  ;;  %2273 = vmatprep.subr.bf16.mxu1 %v3865_v52  ;;  %v3935_v51 = vld [vmem:[#allocation6 + $0x12c] ss:$28 sps:$4 sm:$0xff]  }
 0x211   :  { %v3936_v52 = vld [vmem:[#allocation6 + $0x2f0] ss:$28 sps:$4 sm:$0xff]  }
 0x212   :  { %2192 = vmatpush1.bf16.msra.mxu0 %v3860_v54  ;;  %2274 = vmatpush1.bf16.msra.mxu1 %v3863_v55  ;;  %v3933_v54 = vld [vmem:[#allocation6 + $0x128] ss:$28 sps:$4 sm:$0xff]   ;;  %v3937_v55 = vld [vmem:[#allocation6 + $0x130] ss:$28 sps:$4 sm:$0xff]  }
 0x213   :  { %2193 = vmatprep.subr.bf16.mxu0 %v3868_v56  ;;  %2275 = vmatprep.subr.bf16.mxu1 %v3871_v57  ;;  %v3940_v56 = vld [vmem:[#allocation6 + $0x164] ss:$28 sps:$4 sm:$0xff]  }
 0x214   :  { %v3941_v57 = vld [vmem:[#allocation6 + $0x328] ss:$28 sps:$4 sm:$0xff]  }
 0x216   :  { %2194 = vmatpush1.bf16.msra.mxu0 %v3866_v58  ;;  %2276 = vmatpush1.bf16.msra.mxu1 %v3869_v59  ;;  %v3938_v58 = vld [vmem:[#allocation6 + $0x160] ss:$28 sps:$4 sm:$0xff]   ;;  %v3942_v59 = vld [vmem:[#allocation6 + $0x168] ss:$28 sps:$4 sm:$0xff]  }
 0x217   :  { %2195 = vmatprep.subr.bf16.mxu0 %v3874_v60  ;;  %2277 = vmatprep.subr.bf16.mxu1 %v3877_v61  ;;  %v3945_v60 = vld [vmem:[#allocation6 + $0x19c] ss:$28 sps:$4 sm:$0xff]  }
 0x218   :  { %v3946_v61 = vld [vmem:[#allocation6 + $0x360] ss:$28 sps:$4 sm:$0xff]  }
 0x21a   :  { %2196 = vmatpush1.bf16.msra.mxu0 %v3872_v62  ;;  %2278 = vmatpush1.bf16.msra.mxu1 %v3875_v0  ;;  %v3943_v62 = vld [vmem:[#allocation6 + $0x198] ss:$28 sps:$4 sm:$0xff]   ;;  %v3947_v0 = vld [vmem:[#allocation6 + $0x1a0] ss:$28 sps:$4 sm:$0xff]  }
 0x21b   :  { %2197 = vmatprep.subr.bf16.mxu0 %v3880_v2  ;;  %2279 = vmatprep.subr.bf16.mxu1 %v3883_v3  ;;  %v3950_v2 = vld [vmem:[#allocation6 + $0x1d4] ss:$28 sps:$4 sm:$0xff]  }
 0x21c   :  { %v3948_v3 = vld [vmem:[#allocation6 + $0x1d0] ss:$28 sps:$4 sm:$0xff]  }
 0x21e   :  { %2198 = vmatpush1.bf16.msra.mxu0 %v3878_v4  ;;  %2280 = vmatpush1.bf16.msra.mxu1 %v3881_v5  ;;  %v3951_v4 = vld [vmem:[#allocation6 + $0x398] ss:$28 sps:$4 sm:$0xff]   ;;  %v3954_v5 = vld [vmem:[#allocation6 + $0x20c] ss:$28 sps:$4 sm:$0xff]  }
 0x21f   :  { %2199 = vmatprep.subr.bf16.mxu0 %v3886_v6  ;;  %2281 = vmatprep.subr.bf16.mxu1 %v3889_v7  ;;  %v3952_v6 = vld [vmem:[#allocation6 + $0x208] ss:$28 sps:$4 sm:$0xff]   ;;  %v3955_v7 = vld [vmem:[#allocation6 + $0x3d0] ss:$28 sps:$4 sm:$0xff]  }
 0x222   :  { %2200 = vmatpush1.bf16.msra.mxu0 %v3884_v8  ;;  %2282 = vmatpush1.bf16.msra.mxu1 %v3887_v9  ;;  %v3958_v8 = vld [vmem:[#allocation6 + $0x244] ss:$28 sps:$4 sm:$0xff]  }
 0x223   :  { %2201 = vmatprep.subr.bf16.mxu0 %v3892_v10  ;;  %2283 = vmatprep.subr.bf16.mxu1 %v3895_v11  ;;  %v3956_v9 = vld [vmem:[#allocation6 + $0x240] ss:$28 sps:$4 sm:$0xff]   ;;  %v3959_v10 = vld [vmem:[#allocation6 + $0x408] ss:$28 sps:$4 sm:$0xff]  }
 0x224   :  { %v3962_v11 = vld [vmem:[#allocation6 + $0x27c] ss:$28 sps:$4 sm:$0xff]  }
 0x226   :  { %2202 = vmatpush1.bf16.msra.mxu0 %v3890_v12  ;;  %2284 = vmatpush1.bf16.msra.mxu1 %v3893_v13  ;;  %v3960_v12 = vld [vmem:[#allocation6 + $0x278] ss:$28 sps:$4 sm:$0xff]   ;;  %v3963_v13 = vld [vmem:[#allocation6 + $0x440] ss:$28 sps:$4 sm:$0xff]  }
 0x227   :  { %2203 = vmatprep.subr.bf16.mxu0 %v3898_v15  ;;  %2285 = vmatprep.subr.bf16.mxu1 %v3901_v18  ;;  %v3964_v15 = vld [vmem:[#allocation6 + $0x2b0] ss:$28 sps:$4 sm:$0xff]   ;;  %v3967_v18 = vld [vmem:[#allocation6 + $0x478] ss:$28 sps:$4 sm:$0xff]  }
 0x22a   :  { %2204 = vmatpush1.bf16.msra.mxu0 %v3896_v21  ;;  %2286 = vmatpush1.bf16.msra.mxu1 %v3899_v22  ;;  %v3970_v21 = vld [vmem:[#allocation6 + $0x2ec] ss:$28 sps:$4 sm:$0xff]  }
 0x22b   :  { %2205 = vmatprep.subr.bf16.mxu0 %v3904_v24  ;;  %2287 = vmatprep.subr.bf16.mxu1 %v3907_v25  ;;  %v3968_v22 = vld [vmem:[#allocation6 + $0x2e8] ss:$28 sps:$4 sm:$0xff]   ;;  %v3972_v25 = vld [vmem:[#allocation6 + $0x320] ss:$28 sps:$4 sm:$0xff]  }
 0x22c   :  { %v3974_v24 = vld [vmem:[#allocation6 + $0x324] ss:$28 sps:$4 sm:$0xff]  }
 0x22e   :  { %2206 = vmatpush1.bf16.msra.mxu0 %v3902_v26  ;;  %2288 = vmatpush1.bf16.msra.mxu1 %v3905_v27  ;;  %v3975_v26 = vld [vmem:[#allocation6 + $0x4e8] ss:$28 sps:$4 sm:$0xff]   ;;  %v3978_v27 = vld [vmem:[#allocation6 + $0x35c] ss:$28 sps:$4 sm:$0xff]  }
 0x22f   :  { %2312 = vmatprep.subr.bf16.mxu0 %v3910_v29  ;;  %3459 = vmatprep.subr.bf16.mxu1 %v3911_v30  ;;  %v3979_v29 = vld [vmem:[#allocation6 + $0x520] ss:$28 sps:$4 sm:$0xff]   ;;  %v3982_v30 = vld [vmem:[#allocation6 + $0x394] ss:$28 sps:$4 sm:$0xff]  }
 0x231   :  { %2222 = vmatmul.mubr.bf16.vlgmr.msra.gmra.mrb[8].mxu0 %v4299_v32  ;;  %2304 = vmatmul.mubr.bf16.vlgmr.msra.gmra.mrb[8].mxu1 %v4299_v32 }
 0x232   :  { %2313 = vmatpush1.bf16.msra.mxu0 %v3908_v31  ;;  %2344 = vmatprep.mubr.bf16.mxu0 %v4282_v47  ;;  %v3980_v31 = vld [vmem:[#allocation6 + $0x390] ss:$28 sps:$4 sm:$0xff]  }
 0x233   :  { %3460 = vmatpush3.bf16.msra.mxu1 %v3912_v33  ;;  %2426 = vmatprep.mubr.bf16.mxu1 %v4282_v47  ;;  %v3931_v47 = vld [vmem:[#allocation6 + $0x2b8] ss:$28 sps:$4 sm:$0xff]  }
 0x234   :  { %2314 = vmatprep.subr.bf16.mxu0 %v3915_v34  ;;  %3461 = vmatprep.subr.bf16.mxu1 %v3916_v35  ;;  %v3983_v33 = vld [vmem:[#allocation6 + $0x558] ss:$28 sps:$4 sm:$0xff]   ;;  %v3986_v34 = vld [vmem:[#allocation6 + $0x3cc] ss:$28 sps:$4 sm:$0xff]   ;;  %v4008_v35 = vld [vmem:[%s4515_s7 + $0x40] sm:$0xff]  }
 0x236   :  { %2315 = vmatpush1.bf16.msra.mxu0 %v3913_v36  ;;  %v3984_v36 = vld [vmem:[#allocation6 + $0x3c8] ss:$28 sps:$4 sm:$0xff]  }
 0x237   :  { %3462 = vmatpush3.bf16.msra.mxu1 %v3917_v37  ;;  %2316 = vmatprep.subr.bf16.mxu0 %v3920_v38  ;;  %v3989_v37 = vld [vmem:[#allocation6 + $0x404] ss:$28 sps:$4 sm:$0xff]  }
 0x238   :  { %3463 = vmatprep.subr.bf16.mxu1 %v3921_v39  ;;  %v4010_v38 = vld [vmem:[%s4515_s7] sm:$0xff]  }
 0x239   :  { %v3992_v39 = vld [vmem:[#allocation6 + $0x43c] ss:$28 sps:$4 sm:$0xff]  }
 0x23a   :  { %2317 = vmatpush1.bf16.msra.mxu0 %v3918_v40  ;;  %v4016_v40 = vld [vmem:[%s4515_s7 + $0x50] sm:$0xff]  }
 0x23b   :  { %3464 = vmatpush3.bf16.msra.mxu1 %v3922_v41  ;;  %2318 = vmatprep.subr.bf16.mxu0 %v3925_v42  ;;  %v3990_v41 = vld [vmem:[#allocation6 + $0x438] ss:$28 sps:$4 sm:$0xff]  }
 0x23c   :  { %3465 = vmatprep.subr.bf16.mxu1 %v3926_v43  ;;  %v3995_v42 = vld [vmem:[#allocation6 + $0x474] ss:$28 sps:$4 sm:$0xff]  }
 0x23d   :  { %v4018_v43 = vld [vmem:[%s4515_s7 + $0x10] sm:$0xff]  }
 0x23e   :  { %2319 = vmatpush1.bf16.msra.mxu0 %v3923_v44  ;;  %v4020_v44 = vld [vmem:[%s4515_s7 + $0x58] sm:$0xff]  }
 0x23f   :  { %3466 = vmatpush3.bf16.msra.mxu1 %v3927_v45  ;;  %2320 = vmatprep.subr.bf16.mxu0 %v3930_v46  ;;  %v3993_v45 = vld [vmem:[#allocation6 + $0x470] ss:$28 sps:$4 sm:$0xff]  }
 0x240   :  { %3467 = vmatprep.subr.bf16.mxu1 %v3931_v47  ;;  %v3998_v46 = vld [vmem:[#allocation6 + $0x4ac] ss:$28 sps:$4 sm:$0xff]   ;;  %v4022_v47 = vld [vmem:[%s4515_s7 + $0x18] sm:$0xff]  }
 0x242   :  { %2321 = vmatpush1.bf16.msra.mxu0 %v3928_v48  ;;  %v4024_v48 = vld [vmem:[%s4515_s7 + $0x60] sm:$0xff]  }
 0x243   :  { %3468 = vmatpush3.bf16.msra.mxu1 %v3932_v49  ;;  %2322 = vmatprep.subr.bf16.mxu0 %v3935_v51  ;;  %v3996_v49 = vld [vmem:[#allocation6 + $0x4a8] ss:$28 sps:$4 sm:$0xff]  }
 0x244   :  { %3469 = vmatprep.subr.bf16.mxu1 %v3936_v52  ;;  %v4001_v51 = vld [vmem:[#allocation6 + $0x4e4] ss:$28 sps:$4 sm:$0xff]  }
 0x245   :  { %v4026_v52 = vld [vmem:[%s4515_s7 + $0x20] sm:$0xff]  }
 0x246   :  { %2323 = vmatpush1.bf16.msra.mxu0 %v3933_v54  ;;  %v4028_v54 = vld [vmem:[%s4515_s7 + $0x68] sm:$0xff]  }
 0x247   :  { %3470 = vmatpush3.bf16.msra.mxu1 %v3937_v55  ;;  %2324 = vmatprep.subr.bf16.mxu0 %v3940_v56  ;;  %v3999_v55 = vld [vmem:[#allocation6 + $0x4e0] ss:$28 sps:$4 sm:$0xff]  }
 0x248   :  { %3471 = vmatprep.subr.bf16.mxu1 %v3941_v57  ;;  %v4004_v56 = vld [vmem:[#allocation6 + $0x51c] ss:$28 sps:$4 sm:$0xff]   ;;  %v4030_v57 = vld [vmem:[%s4515_s7 + $0x28] sm:$0xff]  }
 0x24a   :  { %2325 = vmatpush1.bf16.msra.mxu0 %v3938_v58  ;;  %v4032_v58 = vld [vmem:[%s4515_s7 + $0x70] sm:$0xff]  }
 0x24b   :  { %3472 = vmatpush3.bf16.msra.mxu1 %v3942_v59  ;;  %2326 = vmatprep.subr.bf16.mxu0 %v3945_v60  ;;  %v4002_v59 = vld [vmem:[#allocation6 + $0x518] ss:$28 sps:$4 sm:$0xff]  }
 0x24c   :  { %3473 = vmatprep.subr.bf16.mxu1 %v3946_v61  ;;  %v4007_v60 = vld [vmem:[#allocation6 + $0x554] ss:$28 sps:$4 sm:$0xff]  }
 0x24d   :  { %v4034_v61 = vld [vmem:[%s4515_s7 + $0x30] sm:$0xff]  }
 0x24e   :  { %2327 = vmatpush1.bf16.msra.mxu0 %v3943_v62  ;;  %v4036_v62 = vld [vmem:[%s4515_s7 + $0x78] sm:$0xff]  }
 0x24f   :  { %3474 = vmatpush3.bf16.msra.mxu1 %v3947_v0  ;;  %2328 = vmatprep.subr.bf16.mxu0 %v3950_v2  ;;  %v4005_v0 = vld [vmem:[#allocation6 + $0x550] ss:$28 sps:$4 sm:$0xff]   ;;  %v4009_v2 = vld [vmem:[%s4515_s7 + $0xc0] sm:$0xff]  }
 0x250   :  { %2434 = vmatprep.subr.bf16.mxu1 %v4136_v1 }
 0x252   :  { %2427 = vmatmul.mubr.bf16.vlgmr.msra.gmra.mrb[12].mxu1 %v4284_v50  ;;  %2329 = vmatpush1.bf16.msra.mxu0 %v3948_v3  ;;  %v4038_v3 = vld [vmem:[%s4515_s7 + $0x38] sm:$0xff]  }
 0x253   :  { %2435 = vmatpush1.bf16.msra.mxu1 %v3951_v4  ;;  %3405 = vmatprep.mubr.msk.bf16.mxu1 %vm832_vm2, %v4288_v53  ;;  %v4011_v4 = vld [vmem:[%s4515_s7 + $0x80] sm:$0xff]  }
 0x254   :  { %2330 = vmatprep.subr.bf16.mxu0 %v3954_v5  ;;  %2436 = vmatprep.subr.bf16.mxu1 %v4136_v1  ;;  %v4013_v5 = vld [vmem:[%s4515_s7 + $0xc8] sm:$0xff]  }
 0x256   :  { %2331 = vmatpush1.bf16.msra.mxu0 %v3952_v6  ;;  %v4015_v6 = vld [vmem:[%s4515_s7 + $0x88] sm:$0xff]  }
 0x257   :  { %2437 = vmatpush1.bf16.msra.mxu1 %v3955_v7  ;;  %2332 = vmatprep.subr.bf16.mxu0 %v3958_v8  ;;  %v4017_v7 = vld [vmem:[%s4515_s7 + $0xd0] sm:$0xff]  }
 0x258   :  { %2438 = vmatprep.subr.bf16.mxu1 %v4136_v1  ;;  %v4019_v8 = vld [vmem:[%s4515_s7 + $0x90] sm:$0xff]  }
 0x25a   :  { %2333 = vmatpush1.bf16.msra.mxu0 %v3956_v9  ;;  %v4023_v9 = vld [vmem:[%s4515_s7 + $0x98] sm:$0xff]  }
 0x25b   :  { %2439 = vmatpush1.bf16.msra.mxu1 %v3959_v10  ;;  %2334 = vmatprep.subr.bf16.mxu0 %v3962_v11  ;;  %v4025_v10 = vld [vmem:[%s4515_s7 + $0xe0] sm:$0xff]  }
 0x25c   :  { %2440 = vmatprep.subr.bf16.mxu1 %v4136_v1  ;;  %v4027_v11 = vld [vmem:[%s4515_s7 + $0xa0] sm:$0xff]  }
 0x25e   :  { %2335 = vmatpush1.bf16.msra.mxu0 %v3960_v12  ;;  %v4029_v12 = vld [vmem:[%s4515_s7 + $0xe8] sm:$0xff]  }
 0x25f   :  { %2441 = vmatpush1.bf16.msra.mxu1 %v3963_v13  ;;  %2336 = vmatprep.subr.bf16.mxu0 %v3966_v14  ;;  %v4031_v13 = vld [vmem:[%s4515_s7 + $0xa8] sm:$0xff]   ;;  %v4033_v14 = vld [vmem:[%s4515_s7 + $0xf0] sm:$0xff]  }
 0x260   :  { %2442 = vmatprep.subr.bf16.mxu1 %v4136_v1 }
 0x262   :  { %2337 = vmatpush1.bf16.msra.mxu0 %v3964_v15  ;;  %v4035_v15 = vld [vmem:[%s4515_s7 + $0xb0] sm:$0xff]  }
 0x263   :  { %2443 = vmatpush1.bf16.msra.mxu1 %v3967_v18  ;;  %2338 = vmatprep.subr.bf16.mxu0 %v3970_v21  ;;  %v4037_v18 = vld [vmem:[%s4515_s7 + $0xf8] sm:$0xff]  }
 0x264   :  { %2444 = vmatprep.subr.bf16.mxu1 %v4136_v1  ;;  %v4039_v21 = vld [vmem:[%s4515_s7 + $0xb8] sm:$0xff]  }
 0x266   :  { %2339 = vmatpush1.bf16.msra.mxu0 %v3968_v22  ;;  %v4137_v22 = vmov 0.0  }
 0x267   :  { %2445 = vmatpush1.bf16.msra.mxu1 %v3971_v23  ;;  %2340 = vmatprep.subr.bf16.mxu0 %v3974_v24  ;;  %v4042_v23 = vld [vmem:[%s4515_s7 + $0x140] sm:$0xff]  }
 0x268   :  { %2446 = vmatprep.subr.bf16.mxu1 %v4136_v1  ;;  %v3458_v24 = vld [vmem:[%s4517_s9] ss:$0 sm:$0xff] }
 0x269   :  { %3066 = vrot.lane.b32.xlu0 %v3458_v24, %s4138_s16 }
 0x26a   :  { %2341 = vmatpush1.bf16.msra.mxu0 %v3972_v25  ;;  %v4427_v25 = vld [vmem:[%s4514_s6] sm:$0x7f] }
 0x26b   :  { %2447 = vmatpush1.bf16.msra.mxu1 %v3975_v26  ;;  %2342 = vmatprep.subr.bf16.mxu0 %v3978_v27  ;;  %v1213_v26 = vrot.slane %v4427_v25, %v4240_v17  ;;  %v1221_v27 = vrot.slane %v4427_v25, %v4264_v63 }
 0x26c   :  { %2448 = vmatprep.subr.bf16.mxu1 %v4136_v1 }
 0x26e   :  { %2343 = vmatpush1.bf16.msra.mxu0 %v3976_v28  ;;  %v1217_v28 = vrot.slane %v4427_v25, %v4248_v19 }
 0x26f   :  { %2449 = vmatpush1.bf16.msra.mxu1 %v3979_v29  ;;  %2353 = vmatprep.subr.bf16.mxu0 %v3982_v30  ;;  %v1225_v29 = vrot.slane %v4427_v25, %v4251_v20  ;;  %v4040_v20 = vld [vmem:[%s4515_s7 + $0x180] sm:$0xff]  }
 0x270   :  { %2450 = vmatprep.subr.bf16.mxu1 %v4136_v1  ;;  %v4012_v1 = vld [vmem:[%s4515_s7 + $0x48] sm:$0xff]  }
 0x271   :  { %2345 = vmatmul.mubr.bf16.vlgmr.msra.gmra.mrb[12].mxu0 %v4284_v50  ;;  %v3987_v50 = vld [vmem:[#allocation6 + $0x400] ss:$28 sps:$4 sm:$0xff]  }
 0x272   :  { %2354 = vmatpush1.bf16.msra.mxu0 %v3980_v31  ;;  %3404 = vmatprep.mubr.msk.bf16.mxu0 %vm832_vm2, %v4288_v53  ;;  %v4014_v53 = vld [vmem:[%s4515_s7 + $0x8] sm:$0xff]  }
 0x273   :  { %2451 = vmatpush1.bf16.msra.mxu1 %v3983_v33  ;;  %2355 = vmatprep.subr.bf16.mxu0 %v3986_v34 }
 0x274   :  { %3481 = vmatprep.subr.bf16.mxu1 %v4008_v35 }
 0x276   :  { %2467 = vmatmul.mubr.bf16.vlgmr.msra.gmra.mrb[16].mxu1 %v4299_v32  ;;  %2356 = vmatpush1.bf16.msra.mxu0 %v3984_v36 }
 0x277   :  { %2357 = vmatprep.subr.bf16.mxu0 %v3989_v37  ;;  %3482 = vmatpush3.bf16.msra.mxu1 %v4010_v38 }
 0x278   :  { %3483 = vmatprep.subr.bf16.mxu1 %v4012_v1 }
 0x27a   :  { %2358 = vmatpush1.bf16.msra.mxu0 %v3987_v50 }
 0x27b   :  { %2359 = vmatprep.subr.bf16.mxu0 %v3992_v39  ;;  %3484 = vmatpush3.bf16.msra.mxu1 %v4014_v53 }
 0x27c   :  { %3485 = vmatprep.subr.bf16.mxu1 %v4016_v40 }
 0x27e   :  { %2360 = vmatpush1.bf16.msra.mxu0 %v3990_v41 }
 0x27f   :  { %2361 = vmatprep.subr.bf16.mxu0 %v3995_v42  ;;  %3486 = vmatpush3.bf16.msra.mxu1 %v4018_v43 }
 0x280   :  { %3487 = vmatprep.subr.bf16.mxu1 %v4020_v44 }
 0x282   :  { %2362 = vmatpush1.bf16.msra.mxu0 %v3993_v45  ;;  %v4043_v45 = vld [vmem:[%s4515_s7 + $0x100] sm:$0xff]  }
 0x283   :  { %2363 = vmatprep.subr.bf16.mxu0 %v3998_v46  ;;  %3488 = vmatpush3.bf16.msra.mxu1 %v4022_v47  ;;  %v4044_v46 = vld [vmem:[%s4515_s7 + $0x148] sm:$0xff]  }
 0x284   :  { %3489 = vmatprep.subr.bf16.mxu1 %v4024_v48  ;;  %v4041_v47 = vld [vmem:[%s4515_s7 + $0x188] sm:$0xff]  }
 0x285   :  { %v4045_v48 = vld [vmem:[%s4515_s7 + $0x108] sm:$0xff]  }
 0x286   :  { %2364 = vmatpush1.bf16.msra.mxu0 %v3996_v49  ;;  %v4046_v49 = vld [vmem:[%s4515_s7 + $0x150] sm:$0xff]  }
 0x287   :  { %2365 = vmatprep.subr.bf16.mxu0 %v4001_v51  ;;  %3490 = vmatpush3.bf16.msra.mxu1 %v4026_v52  ;;  %v4047_v51 = vld [vmem:[%s4515_s7 + $0x110] sm:$0xff]   ;;  %v4048_v52 = vld [vmem:[%s4515_s7 + $0x158] sm:$0xff]  }
 0x288   :  { %3491 = vmatprep.subr.bf16.mxu1 %v4028_v54  ;;  %v4049_v54 = vld [vmem:[%s4515_s7 + $0x118] sm:$0xff]  }
 0x28a   :  { %2366 = vmatpush1.bf16.msra.mxu0 %v3999_v55  ;;  %v4050_v55 = vld [vmem:[%s4515_s7 + $0x160] sm:$0xff]  }
 0x28b   :  { %2367 = vmatprep.subr.bf16.mxu0 %v4004_v56  ;;  %3492 = vmatpush3.bf16.msra.mxu1 %v4030_v57  ;;  %v4051_v56 = vld [vmem:[%s4515_s7 + $0x120] sm:$0xff]   ;;  %v4052_v57 = vld [vmem:[%s4515_s7 + $0x168] sm:$0xff]  }
 0x28c   :  { %3493 = vmatprep.subr.bf16.mxu1 %v4032_v58  ;;  %v4053_v58 = vld [vmem:[%s4515_s7 + $0x128] sm:$0xff]  }
 0x28e   :  { %2368 = vmatpush1.bf16.msra.mxu0 %v4002_v59  ;;  %v4054_v59 = vld [vmem:[%s4515_s7 + $0x170] sm:$0xff]  }
 0x28f   :  { %2369 = vmatprep.subr.bf16.mxu0 %v4007_v60  ;;  %3494 = vmatpush3.bf16.msra.mxu1 %v4034_v61  ;;  %v4055_v60 = vld [vmem:[%s4515_s7 + $0x130] sm:$0xff]   ;;  %v4056_v61 = vld [vmem:[%s4515_s7 + $0x178] sm:$0xff]  }
 0x290   :  { %3495 = vmatprep.subr.bf16.mxu1 %v4036_v62 }
 0x292   :  { %2370 = vmatpush1.bf16.msra.mxu0 %v4005_v0 }
 0x293   :  { %3503 = vmatprep.subr.bf16.mxu0 %v4009_v2  ;;  %3496 = vmatpush3.bf16.msra.mxu1 %v4038_v3 }
 0x294   :  { %3525 = vmatprep.subr.bf16.mxu1 %v4042_v23 }
 0x295   :  { %2386 = vmatmul.mubr.bf16.vlgmr.msra.gmra.mrb[12].mxu0 %v4299_v32  ;;  %v4021_v32 = vld [vmem:[%s4515_s7 + $0xd8] sm:$0xff]  }
 0x296   :  { %3504 = vmatpush3.bf16.msra.mxu0 %v4011_v4  ;;  %v4057_v4 = vld [vmem:[%s4515_s7 + $0x138] sm:$0xff]   ;;  %s4140_s7 = smov 127  }
 0x297   :  { %3505 = vmatprep.subr.bf16.mxu0 %v4013_v5 }
 0x29a   :  { %3506 = vmatpush3.bf16.msra.mxu0 %v4015_v6  ;;  %v1236_v6 = vsub.s32 6, %v4237_v16 }
 0x29b   :  { %3507 = vmatprep.subr.bf16.mxu0 %v4017_v7 }
 0x29c   :  { %v1237_v7 = vrot.slane %v4427_v25, %v1236_v6 }
 0x29e   :  { %3508 = vmatpush3.bf16.msra.mxu0 %v4019_v8 }
 0x29f   :  { %3509 = vmatprep.subr.bf16.mxu0 %v4021_v32 }
 0x2a2   :  { %3510 = vmatpush3.bf16.msra.mxu0 %v4023_v9 }
 0x2a3   :  { %3511 = vmatprep.subr.bf16.mxu0 %v4025_v10 }
 0x2a6   :  { %3512 = vmatpush3.bf16.msra.mxu0 %v4027_v11 }
 0x2a7   :  { %3513 = vmatprep.subr.bf16.mxu0 %v4029_v12 }
 0x2aa   :  { %3514 = vmatpush3.bf16.msra.mxu0 %v4031_v13 }
 0x2ab   :  { %3515 = vmatprep.subr.bf16.mxu0 %v4033_v14 }
 0x2ae   :  { %3516 = vmatpush3.bf16.msra.mxu0 %v4035_v15  ;;  %v1228_v15 = vsub.s32 4, %v4237_v16 }
 0x2af   :  { %3517 = vmatprep.subr.bf16.mxu0 %v4037_v18  ;;  %v1232_v18 = vsub.s32 5, %v4237_v16 }
 0x2b2   :  { %3518 = vmatpush3.bf16.msra.mxu0 %v4039_v21  ;;  %v1229_v21 = vrot.slane %v4427_v25, %v1228_v15 }
 0x2b3   :  { %3550 = vmatprep.subr.bf16.mxu0 %v4137_v22 }
 0x304   :  { %v2223_v30 = vpop.f32.mrb[8].mxu0  ;;  %v2305_v31 = vpop.f32.mrb[8].mxu1 }
 0x305   :  { %v3562_v33 = vadd.f32 %v2223_v30, %v1213_v26  ;;  %v3564_v34 = vadd.f32 %v2305_v31, %v1221_v27  ;;  %v2225_v35 = vpop.f32.mrb[9].mxu0  ;;  %v2307_v36 = vpop.f32.mrb[9].mxu1 }
 0x306   :  { %v3563_v37 = vadd.f32 %v2225_v35, %v1217_v28  ;;  %v3565_v38 = vadd.f32 %v2307_v36, %v1225_v29  ;;  %v2227_v1 = vpop.f32.mrb[10].mxu0  ;;  %v2309_v50 = vpop.f32.mrb[10].mxu1 }
 0x307   :  { %v2474_v17 = vmax.f32 %v3562_v33, 0.0  ;;  %v2476_v39 = vmax.f32 %v3564_v34, 0.0  ;;  %v2228_v53 = vpop.f32.mrb[11].mxu0  ;;  %v2310_v63 = vpop.f32.mrb[11].mxu1 }
 0x308   :  { %v2475_v40 = vmax.f32 %v3563_v37, 0.0  ;;  %v2477_v41 = vmax.f32 %v3565_v38, 0.0 }
 0x309   :  { %v2481_v43 = vpack.c.bf16 %v2474_v17, %v2474_v17  ;;  %v2483_v44 = vpack.c.bf16 %v2476_v39, %v2476_v39 }
 0x30a   :  { %v2482_v19 = vpack.c.bf16 %v2475_v40, %v2475_v40  ;;  %v2484_v42 = vpack.c.bf16 %v2477_v41, %v2477_v41 }
 0x30c   :  { %2924 = vmatprep.mubr.bf16.mxu1 %v2482_v19  ;;  %2964 = vmatprep.mubr.bf16.mxu0 %v2484_v42 }
 0x30d   :  { %2925 = vmatmul.mubr.bf16.vlgmr.msra.gmra.mrb[20].mxu1 %v2481_v43  ;;  %2965 = vmatmul.mubr.bf16.vlgmr.msra.gmra.mrb[16].mxu0 %v2483_v44 }
 0x30e   :  { %3551 = vmatpush3.bf16.msra.mxu0 %v4040_v20  ;;  %3554 = vmatprep.mubr.msk.bf16.mxu0 %vm4139_vm3, %v4137_v22 }
 0x30f   :  { %3552 = vmatprep.subr.bf16.mxu0 %v4137_v22  ;;  %3526 = vmatpush3.bf16.msra.mxu1 %v4043_v45  ;;  %v1233_v22 = vrot.slane %v4427_v25, %v1232_v18 }
 0x310   :  { %3527 = vmatprep.subr.bf16.mxu1 %v4044_v46 }
 0x312   :  { %3553 = vmatpush3.bf16.msra.mxu0 %v4041_v47  ;;  %v3067_v47 = vpop.permute.xlu0 %3066 }
 0x313   :  { %3528 = vmatpush3.bf16.msra.mxu1 %v4045_v48 }
 0x314   :  { %3529 = vmatprep.subr.bf16.mxu1 %v4046_v49 }
 0x317   :  { %3530 = vmatpush3.bf16.msra.mxu1 %v4047_v51 }
 0x318   :  { %3531 = vmatprep.subr.bf16.mxu1 %v4048_v52 }
 0x31b   :  { %3532 = vmatpush3.bf16.msra.mxu1 %v4049_v54  ;;  %v3457_v54 = vld [vmem:[#allocation2] ss:$0 sm:$0xff] }
 0x31c   :  { %3533 = vmatprep.subr.bf16.mxu1 %v4050_v55 }
 0x31f   :  { %3534 = vmatpush3.bf16.msra.mxu1 %v4051_v56 }
 0x320   :  { %3535 = vmatprep.subr.bf16.mxu1 %v4052_v57 }
 0x323   :  { %3536 = vmatpush3.bf16.msra.mxu1 %v4053_v58 }
 0x324   :  { %3537 = vmatprep.subr.bf16.mxu1 %v4054_v59 }
 0x325   :  { %v3475_v62 = vpop.f32.mrb[12].mxu1 }
 0x326   :  { %v3476_v0 = vpop.f32.mrb[13].mxu1 }
 0x327   :  { %v3477_v2 = vadd.f32 %v3476_v0, %v3475_v62  ;;  %v3478_v3 = vpop.f32.mrb[14].mxu1  ;;  %3538 = vmatpush3.bf16.msra.mxu1 %v4055_v60 }
 0x328   :  { %v3479_v5 = vpop.f32.mrb[15].mxu1  ;;  %3539 = vmatprep.subr.bf16.mxu1 %v4056_v61 }
 0x329   :  { %v2429_v8 = vadd.f32 %v3477_v2, %v1237_v7 }
 0x32b   :  { %3540 = vmatpush3.bf16.msra.mxu1 %v4057_v4 }
 0x349   :  { %v2468_v32 = vpop.f32.mrb[16].mxu1 }
 0x34a   :  { %v2469_v9 = vadd.f32 %v2468_v32, %v2429_v8  ;;  %v2470_v10 = vpop.f32.mrb[17].mxu1 }
 0x34b   :  { %v2471_v11 = vpop.f32.mrb[18].mxu1 }
 0x34c   :  { %v2480_v12 = vmax.f32 %v2469_v9, 0.0  ;;  %v2472_v13 = vpop.f32.mrb[19].mxu1 }
 0x34e   :  { %v2487_v14 = vpack.c.bf16 %v2480_v12, %v2480_v12 }
 0x350   :  { %3555 = vmatmul.mubr.msk.bf16.vlgmr.msra.gmra.mrb[20].mxu0 %vm2888_vm4, %v2487_v14 }
 0x368   :  { %v2387_v23 = vpop.f32.mrb[12].mxu0 }
 0x369   :  { %v3566_v24 = vadd.f32 %v2387_v23, %v1229_v21  ;;  %v2389_v26 = vpop.f32.mrb[13].mxu0 }
 0x36a   :  { %v3567_v27 = vadd.f32 %v2389_v26, %v1233_v22  ;;  %v2391_v28 = vpop.f32.mrb[14].mxu0 }
 0x36b   :  { %v2478_v29 = vmax.f32 %v3566_v24, 0.0  ;;  %v2392_v30 = vpop.f32.mrb[15].mxu0 }
 0x36c   :  { %v2479_v31 = vmax.f32 %v3567_v27, 0.0 }
 0x36d   :  { %v2485_v34 = vpack.c.bf16 %v2478_v29, %v2478_v29 }
 0x36e   :  { %v2486_v33 = vpack.c.bf16 %v2479_v31, %v2479_v31 }
 0x370   :  { %3004 = vmatprep.mubr.bf16.mxu1 %v2486_v33 }
 0x371   :  { %3005 = vmatmul.mubr.bf16.vlgmr.msra.gmra.mrb[24].mxu1 %v2485_v34 }
 0x3e0   :  { %v3497_v35 = vpop.f32.mrb[20].mxu1  ;;  %v3519_v36 = vpop.f32.mrb[16].mxu0 }
 0x3e1   :  { %v3498_v37 = vpop.f32.mrb[21].mxu1  ;;  %v3520_v16 = vpop.f32.mrb[17].mxu0 }
 0x3e2   :  { %v3499_v38 = vadd.f32 %v3498_v37, %v3497_v35  ;;  %v3521_v1 = vadd.f32 %v3520_v16, %v3519_v36  ;;  %v3500_v50 = vpop.f32.mrb[22].mxu1  ;;  %v3522_v25 = vpop.f32.mrb[18].mxu0 }
 0x3e3   :  { %v3501_v17 = vpop.f32.mrb[23].mxu1  ;;  %v3523_v39 = vpop.f32.mrb[19].mxu0 }
 0x3e4   :  { %v2967_v53 = vadd.f32 %v3521_v1, %v3499_v38 }
 0x423   :  { %v3046_v63 = vpop.f32.mrb[20].mxu0 }
 0x424   :  { %v3556_v40 = vpop.f32.mrb[21].mxu0 }
 0x425   :  { %v3049_v41 = vpop.f32.mrb[22].mxu0 }
 0x426   :  { %v3557_v19 = vpop.f32.mrb[23].mxu0 }
 0x444   :  { %v3541_v42 = vpop.f32.mrb[24].mxu1 }
 0x445   :  { %v3542_v20 = vpop.f32.mrb[25].mxu1 }
 0x446   :  { %v3543_v43 = vadd.f32 %v3542_v20, %v3541_v42  ;;  %v3544_v44 = vpop.f32.mrb[26].mxu1 }
 0x447   :  { %v3545_v45 = vpop.f32.mrb[27].mxu1 }
 0x448   :  { %v3007_v46 = vadd.f32 %v3543_v43, %v2967_v53 }
 0x44a   :  { %v3047_v48 = vadd.f32 %v3046_v63, %v3007_v46 }
 0x44c   :  { %v3069_v49 = vadd.f32 %v3067_v47, %v3047_v48  ;;  %v3059_v55 = vadd.f32 %v3457_v54, %v3047_v48 }
 0x44e   :  { %3071 = vrot.lane.b32.xlu0 %v3069_v49, %s4140_s7 }
 0x4c0   :  { %v3072_v51 = vpop.permute.xlu0 %3071 }
 0x4c1   :  { %v3075_v52 = vsel %vm3074_vm5, %v3072_v51, 0.0 }
 0x4c2   :  { %3076 = vadd.xlane.f32.xlu1 %v3075_v52 }
 0x4d3   :  { %3092 = vperm.xlu1 %3602, %v3059_v55  }
 0x54f   :  { %v3077_v56 = vpop.xlane.xlu1 %3076 }
 0x550   :  { %v3078_v57 = vrot.slane %v3077_v56, 4 }
 0x552   :  { %v3079_v58 = vadd.f32 %v3078_v57, %v3077_v56 }
 0x553   :  { %v3093_v3 = vpop.permute.xlu1 %3092 }
 0x554   :  { %v3080_v59 = vrot.slane %v3079_v58, 2 }
 0x556   :  { %v3081_v60 = vadd.f32 %v3080_v59, %v3079_v58 }
 0x558   :  { %v3082_v61 = vrot.slane %v3081_v60, 1 }
 0x55a   :  { %v3083_v62 = vadd.f32 %v3082_v61, %v3081_v60 }
 0x55c   :  { %3588 = vpush %v3083_v62 }
 0x58d   :  { %s3589_s5 = spop %3588 }
 0x58e   :  { %s3087_s8 = smul.f32 0.125, %s3589_s5 }
 0x590   :  { %v3088_v0 = vstv %s3087_s8 }
 0x591   :  { %v3089_v2 = vsub.f32 %v3069_v49, %v3088_v0 }
 0x593   :  { %v3095_v4 = vadd.f32 %v3093_v3, %v3089_v2 }
 0x595   :  { %3097 = vrot.lane.b32.xlu0 %v3095_v4, %s4140_s7 }
 0x607   :  { %v3098_v5 = vpop.permute.xlu0 %3097 }
 0x608   :  { %3100 = vst.msk [vmem:[#allocation8] sm:$0x3] %vm3074_vm5, %v3098_v5 }
 0x609   :  { %4113 = shalt.err (!%p4110_p6)
}
 0x60a   :  { %s4114_s4 = scalar_lea.hbm %s4518_s10, 32 }
 0x60b   :  { %p4115_p7 = scmp.ne.s32.totalorder %s4518_s10, %s4114_s4  ;;  %p4118_p8 = scmp.lt.u32.totalorder %s4114_s4, %s4518_s10 }
 0x60d   :  { %p4120_p9 = pnand %p4118_p8, %p4115_p7 }
 0x60f   :  { %4123 = shalt.err (!%p4120_p9)
}
 0x610   :  { %3110 = dma.vmem_to_hbm [thread:$0]  %s3108_s0, 32, %s4518_s10, [#allocation5]  }
 0x611   :  { %4128 = dma.done.wait [#allocation5], 32  }
 0x612   :  { %4129 = vsyncadd [#allocation5], 4294967264 }
 0x613   :  { %3114 = vsyncpa [#allocation4], 1 }
 0x614   :  { %3115 = vsyncpa [#allocation7], 1 }
 0x615   :  { %3116 = vsyncpa [#allocation5], 1 }

</bundles_post_ra>
